<compile_context>
chip_gen: v5e
topology: v5e:2x2
jax: 0.10.0
libtpu: 0.0.40
codegen_flags: <defaults>
</compile_context>

<pallas_src>
import functools

import jax
import jax.numpy as jnp
from jax import lax
from jax.experimental import pallas as pl
from jax.experimental.pallas import tpu as pltpu


# ---------------------------------------------------------------------------
# Hardware-aware knobs
# ---------------------------------------------------------------------------
def _vmem_limit_bytes():
    """Scoped-VMEM limit: ~physical - 8 MiB, capped at 100 MiB, floored at 32 MiB."""
    try:
        phys = int(pltpu.get_tpu_info().vmem_capacity_bytes)
    except Exception:                     # unknown generation -> safe everywhere
        return 48 * 1024 * 1024
    return int(max(32 << 20, min(phys - (8 << 20), 100 << 20)))


@functools.lru_cache(maxsize=None)
def _single_buffer_weights_supported():
    """Probe whether this build accepts pipeline_mode=pl.Buffered(1) on an input."""
    try:
        def _k(x_ref, o_ref):
            o_ref[...] = x_ref[...]

        x = jnp.zeros((8, 128), jnp.float32)
        jax.block_until_ready(pl.pallas_call(
            _k,
            out_shape=jax.ShapeDtypeStruct((8, 128), jnp.float32),
            grid=(1,),
            in_specs=[pl.BlockSpec((8, 128), lambda i: (0, 0),
                                   pipeline_mode=pl.Buffered(1))],
            out_specs=pl.BlockSpec((8, 128), lambda i: (0, 0)),
        )(x))
        return True
    except Exception:
        return False


def _pick_row_tile(hh, wh, cin, cmid, vmem_bytes, weight_bytes):
    """Largest divisor of Hh whose tile fits the VMEM budget (~<=2048 pooled px)."""
    budget = max(vmem_bytes - weight_bytes - (4 << 20), 4 << 20)
    per_row = (2 * 4 * wh * cin * 2        # x block (bf16), double buffered
               + 2 * 2 * wh * cmid * 2     # out block (bf16), double buffered
               + 72 * wh * cmid            # f32 silu/acc temps + bf16 tap groups
               + 10 * wh * cin)            # phase loads / maxpool temp
    max_rows = max(1, budget // max(per_row, 1))
    target_rows = max(1, (2048 + wh - 1) // wh)   # ~2048 pooled pixels per tile
    rows = int(min(hh, max_rows, target_rows))
    for r in range(rows, 0, -1):
        if hh % r == 0 and ((r * wh) % 8 == 0 or r == hh):
            return r
    return hh


# ---------------------------------------------------------------------------
# Fused kernel: maxpool + conv1(1x1) + conv2(1x1) + conv3(3x3,s2,p1) + "concat"
# ---------------------------------------------------------------------------
def _downsample_fused_kernel(x_ref, w1_ref, w2_ref, w3_ref,
                             b1_ref, b2_ref, b3_ref, o_ref, prev_ref, *, wh):
    # x_ref : (1, 4, Mt, Cin) bf16   -- 2x2 phases (ee, eo, oe, oo), Mt = ROW_TILE*Wh
    # w1/w2 : (Cin, Cmid)     bf16   (BN scale folded in)
    # w3    : (3, 3*Cmid, Cmid) bf16 (per-dy, K-stacked over dx: [dx0; dx1; dx2])
    # b*    : (1, Cmid) f32
    # o_ref : (1, 2, Mt, Cmid) bf16  -- slab 0 = branch x2, slab 1 = branch x4
    # prev  : (Wh, 3*Cmid) bf16 scratch -- previous pooled row's odd-phase tap group
    #         [shift_c(x3_oo), x3_oe, x3_oo], carried across row tiles (conv3 halo).
    t = pl.program_id(1)
    mt = x_ref.shape[2]

    @pl.when(t == 0)
    def _():                                   # image top edge: zero padding row
        prev_ref[...] = jnp.zeros_like(prev_ref)

    ee = x_ref[0, 0]          # x[2r  , 2c  ]
    eo = x_ref[0, 1]          # x[2r  , 2c+1]
    oe = x_ref[0, 2]          # x[2r+1, 2c  ]
    oo = x_ref[0, 3]          # x[2r+1, 2c+1]

    # ---- branch 1: MaxPool2d(2,2) + conv1(1x1) + bias + SiLU ---------------
    xm = jnp.maximum(jnp.maximum(ee, eo), jnp.maximum(oe, oo))
    y1 = jnp.dot(xm, w1_ref[...], preferred_element_type=jnp.float32) + b1_ref[...]
    o_ref[0, 0] = (y1 * jax.nn.sigmoid(y1)).astype(o_ref.dtype)   # store x2 now

    # ---- conv2(1x1)+bias+SiLU on all four phases as ONE matmul -------------
    x_all = x_ref[0].reshape(4 * mt, x_ref.shape[3])
    y2 = jnp.dot(x_all, w2_ref[...], preferred_element_type=jnp.float32) + b2_ref[...]
    x3f = y2 * jax.nn.sigmoid(y2)                                 # f32, VMEM only
    x3 = x3f.astype(jnp.bfloat16)
    x3_ee, x3_eo = x3[0 * mt:1 * mt], x3[1 * mt:2 * mt]
    x3_oe, x3_oo = x3[2 * mt:3 * mt], x3[3 * mt:4 * mt]

    # ---- conv3 (3x3, stride 2, pad 1) as three K=3*Cmid matmuls ------------
    #   out[r,c] = sum_{dy,dx} W[dy,dx] @ x3[2r+dy-1, 2c+dx-1]
    row_start = (lax.broadcasted_iota(jnp.int32, (mt, 1), 0) % wh) == 0

    def shift_c(a):           # previous pooled column; zero at column 0 (left pad)
        r = pltpu.roll(a, shift=1, axis=0)                        # XLU, no copies
        return jnp.where(row_start, jnp.zeros_like(r), r)

    eo_sc = shift_c(x3f[1 * mt:2 * mt]).astype(jnp.bfloat16)
    oo_sc = shift_c(x3f[3 * mt:4 * mt]).astype(jnp.bfloat16)

    g_even = jnp.concatenate([eo_sc, x3_ee, x3_eo], axis=-1)      # dy=1 taps
    g_odd = jnp.concatenate([oo_sc, x3_oe, x3_oo], axis=-1)       # dy=2 taps
    # dy=0 taps = g_odd shifted down by one pooled row; splice the carried halo.
    g_up = jnp.concatenate([prev_ref[...], g_odd[:mt - wh]], axis=0)
    prev_ref[...] = g_odd[mt - wh:]            # halo for the next row tile

    acc = jnp.dot(g_even, w3_ref[1], preferred_element_type=jnp.float32)
    acc += jnp.dot(g_odd, w3_ref[2], preferred_element_type=jnp.float32)
    acc += jnp.dot(g_up, w3_ref[0], preferred_element_type=jnp.float32)
    y4 = acc + b3_ref[...]
    o_ref[0, 1] = (y4 * jax.nn.sigmoid(y4)).astype(o_ref.dtype)   # store x4


# ---------------------------------------------------------------------------
# Module forward (NCHW in / NCHW out, like the PyTorch module; bf16 output)
# ---------------------------------------------------------------------------
def downsample_forward(x_nchw, params, *, row_tile=None):
    n, cin, h, w = x_nchw.shape
    assert h % 2 == 0 and w % 2 == 0, "Downsample requires even H, W"
    hh, wh = h // 2, w // 2
    cmid = params["w1"].shape[1]
    m = hh * wh

    # Fold BN scale into the conv weights (trace-time, free); bf16 MXU operands.
    w1s = (params["w1"] * params["s1"][None, :]).astype(jnp.bfloat16)
    w2s = (params["w2"] * params["s2"][None, :]).astype(jnp.bfloat16)
    w3s = (params["w3"] * params["s3"][None, None, None, :]).astype(jnp.bfloat16)
    w3r = w3s.reshape(3, 3 * cmid, cmid)       # per-dy K-stacked: [dx0; dx1; dx2]
    b1 = params["b1"].reshape(1, cmid).astype(jnp.float32)
    b2 = params["b2"].reshape(1, cmid).astype(jnp.float32)
    b3 = params["b3"].reshape(1, cmid).astype(jnp.float32)

    # NCHW -> phase-major (N, 4, Hh*Wh, Cin) bf16: one fused XLA copy (the
    # NCHW->NHWC transpose + f32->bf16 cast were needed anyway).
    xa = jnp.transpose(x_nchw, (0, 2, 3, 1)).astype(jnp.bfloat16)   # (N,H,W,C)
    xa = xa.reshape(n, hh, 2, wh, 2, cin)
    xa = jnp.transpose(xa, (0, 2, 4, 1, 3, 5)).reshape(n, 4, m, cin)

    vmem_bytes = _vmem_limit_bytes()
    weight_bytes = int(w1s.size * 2 + w2s.size * 2 + w3r.size * 2
                       + (b1.size + b2.size + b3.size) * 4)
    if row_tile is None:
        row_tile = _pick_row_tile(hh, wh, cin, cmid, vmem_bytes, weight_bytes)
    assert hh % row_tile == 0 and ((row_tile * wh) % 8 == 0 or row_tile == hh)
    mt = row_tile * wh
    n_tiles = hh // row_tile

    cost = pl.CostEstimate(
        flops=int(2 * n * m * cmid * (5 * cin + 9 * cmid)),
        transcendentals=int(6 * n * m * cmid),
        bytes_accessed=int(xa.size * 2 + n * 2 * m * cmid * 2 + weight_bytes),
    )

    # Constant (per-grid-step) operands: single-buffer them when supported.
    wmode = ({"pipeline_mode": pl.Buffered(1)}
             if _single_buffer_weights_supported() else {})

    kernel = functools.partial(_downsample_fused_kernel, wh=wh)
    out = pl.pallas_call(
        kernel,
        out_shape=jax.ShapeDtypeStruct((n, 2, m, cmid), jnp.bfloat16),
        grid=(n, n_tiles),
        in_specs=[
            pl.BlockSpec((1, 4, mt, cin), lambda i, t: (i, 0, t, 0)),
            pl.BlockSpec((cin, cmid), lambda i, t: (0, 0), **wmode),
            pl.BlockSpec((cin, cmid), lambda i, t: (0, 0), **wmode),
            pl.BlockSpec((3, 3 * cmid, cmid), lambda i, t: (0, 0, 0), **wmode),
            pl.BlockSpec((1, cmid), lambda i, t: (0, 0), **wmode),
            pl.BlockSpec((1, cmid), lambda i, t: (0, 0), **wmode),
            pl.BlockSpec((1, cmid), lambda i, t: (0, 0), **wmode),
        ],
        out_specs=pl.BlockSpec((1, 2, mt, cmid), lambda i, t: (i, 0, t, 0)),
        scratch_shapes=[pltpu.VMEM((wh, 3 * cmid), jnp.bfloat16)],
        compiler_params=pltpu.CompilerParams(
            # Batch axis shards across cores; the row axis carries the conv3
            # halo scratch and must run in order.
            dimension_semantics=("parallel", "arbitrary"),
            vmem_limit_bytes=vmem_bytes,
        ),
        cost_estimate=cost,
    )(xa, w1s, w2s, w3r, b1, b2, b3)

    # (N, 2, Hh*Wh, Cmid) -> NCHW (N, 2*Cmid, Hh, Wh); channel order = [x2 | x4].
    out = out.reshape(n, 2, hh, wh, cmid)
    out = jnp.transpose(out, (0, 1, 4, 2, 3)).reshape(n, 2 * cmid, hh, wh)
    return out   # bf16: op is HBM-bound, keep the narrow dtype for the consumer


# ---------------------------------------------------------------------------
# Parameter init (deterministic, synthetic) + BN folding to scale/bias
# ---------------------------------------------------------------------------
def init_params(key, in_dim, out_dim, eps=1e-5):
    inter = out_dim // 2
    ks = jax.random.split(key, 12)

    def bn_fold(kg, kb, km, kv, c):
        gamma = 1.0 + 0.1 * jax.random.normal(kg, (c,), jnp.float32)
        beta = 0.1 * jax.random.normal(kb, (c,), jnp.float32)
        mean = 0.1 * jax.random.normal(km, (c,), jnp.float32)
        var = jax.random.uniform(kv, (c,), jnp.float32, 0.5, 1.5)
        scale = gamma / jnp.sqrt(var + eps)
        bias = beta - mean * scale
        return scale, bias

    w1 = 0.2 * jax.random.normal(ks[0], (in_dim, inter), jnp.float32)
    w2 = 0.2 * jax.random.normal(ks[1], (in_dim, inter), jnp.float32)
    w3 = 0.2 * jax.random.normal(ks[2], (3, 3, inter, inter), jnp.float32)  # HWIO
    s1, b1 = bn_fold(ks[3], ks[4], ks[5], ks[6], inter)
    s2, b2 = bn_fold(ks[7], ks[8], ks[9], ks[10], inter)
    s3, b3 = bn_fold(ks[11], ks[3], ks[7], ks[0], inter)
    return dict(w1=w1, w2=w2, w3=w3, s1=s1, b1=b1, s2=s2, b2=b2, s3=s3, b3=b3)


# ---------------------------------------------------------------------------
# Pure-JAX references
# ---------------------------------------------------------------------------
_DN = ("NHWC", "HWIO", "NHWC")


def _silu(y):
    return y * jax.nn.sigmoid(y)


def reference_forward_matched(x_nchw, params):
    """Same math as the kernel: bf16 operands/output, f32 accum, BN folded."""
    x = jnp.transpose(x_nchw, (0, 2, 3, 1)).astype(jnp.bfloat16)
    w1s = (params["w1"] * params["s1"][None, :]).astype(jnp.bfloat16)[None, None]
    w2s = (params["w2"] * params["s2"][None, :]).astype(jnp.bfloat16)[None, None]
    w3s = (params["w3"] * params["s3"][None, None, None, :]).astype(jnp.bfloat16)

    x1 = lax.reduce_window(x, jnp.array(-jnp.inf, x.dtype), lax.max,
                           (1, 2, 2, 1), (1, 2, 2, 1), "VALID")
    y1 = lax.conv_general_dilated(x1, w1s, (1, 1), "VALID", dimension_numbers=_DN,
                                  preferred_element_type=jnp.float32) + params["b1"]
    x2 = _silu(y1)
    y2 = lax.conv_general_dilated(x, w2s, (1, 1), "VALID", dimension_numbers=_DN,
                                  preferred_element_type=jnp.float32) + params["b2"]
    x3 = _silu(y2).astype(jnp.bfloat16)
    y3 = lax.conv_general_dilated(x3, w3s, (2, 2), ((1, 1), (1, 1)),
                                  dimension_numbers=_DN,
                                  preferred_element_type=jnp.float32) + params["b3"]
    x4 = _silu(y3)
    out = jnp.concatenate([x2, x4], axis=-1).astype(jnp.bfloat16)
    return jnp.transpose(out, (0, 3, 1, 2))


def reference_forward_f32(x_nchw, params):
    """Original module semantics in full f32 (BN as post-conv scale/bias)."""
    x = jnp.transpose(x_nchw, (0, 2, 3, 1)).astype(jnp.float32)

    def conv_bn_silu(inp, w_hwio, stride, pad, s, b):
        y = lax.conv_general_dilated(inp, w_hwio, (stride, stride), pad,
                                     dimension_numbers=_DN)
        return _silu(y * s + b)

    x1 = lax.reduce_window(x, -jnp.inf, lax.max, (1, 2, 2, 1), (1, 2, 2, 1), "VALID")
    x2 = conv_bn_silu(x1, params["w1"][None, None], 1, "VALID", params["s1"], params["b1"])
    x3 = conv_bn_silu(x, params["w2"][None, None], 1, "VALID", params["s2"], params["b2"])
    x4 = conv_bn_silu(x3, params["w3"], 2, ((1, 1), (1, 1)), params["s3"], params["b3"])
    out = jnp.concatenate([x2, x4], axis=-1)
    return jnp.transpose(out, (0, 3, 1, 2))


# ---------------------------------------------------------------------------
if __name__ == "__main__":
    N, in_dim, H, W = 2, 4, 16, 16
    out_dim = 8

    key = jax.random.PRNGKey(0)
    kx, kp = jax.random.split(key)
    x = jax.random.normal(kx, (N, in_dim, H, W), jnp.float32)   # NCHW like PyTorch
    params = init_params(kp, in_dim, out_dim)

    _single_buffer_weights_supported()   # warm the probe outside jit tracing

    fwd = jax.jit(downsample_forward, static_argnames=("row_tile",))

    # Auto-picked row tile (single tile at this toy size) and an explicit 2-row
    # tile (4 row tiles -> exercises the carried conv3 halo across the grid).
    out_auto = jax.block_until_ready(fwd(x, params))
    out_tiled = jax.block_until_ready(fwd(x, params, row_tile=2))
    assert out_auto.shape == (N, out_dim, H // 2, W // 2), out_auto.shape
    assert out_tiled.shape == (N, out_dim, H // 2, W // 2), out_tiled.shape

    ref = reference_forward_matched(x, params).astype(jnp.float32)
    ref32 = reference_forward_f32(x, params)

    for out in (out_auto, out_tiled):
        o = out.astype(jnp.float32)
        err = float(jnp.max(jnp.abs(o - ref)))
        assert jnp.allclose(o, ref, atol=2.5e-2, rtol=2.5e-2), err
        err32 = float(jnp.max(jnp.abs(o - ref32)))
        assert jnp.allclose(o, ref32, atol=8e-2, rtol=8e-2), err32

    print("KERNEL_OK")
</pallas_src>

<mosaic_0001>
module attributes {stable_mosaic.version = 11 : i64} {
  func.func @_k(%arg0: i32, %arg1: memref<8x128xf32, #tpu.memory_space<vmem>>, %arg2: memref<8x128xf32, #tpu.memory_space<vmem>>) attributes {dimension_semantics = [#tpu.dimension_semantics<arbitrary>], iteration_bounds = array<i64: 1>, scalar_prefetch = 0 : i64, scratch_operands = 0 : i64, tpu.core_type = #tpu.core_type<tc>, window_params = [{pipeline_mode = #tpu.pipeline_mode<synchronous>, transform_indices = @transform_0, window_bounds = array<i64: 8, 128>}, {pipeline_mode = #tpu.pipeline_mode<synchronous>, transform_indices = @transform_1, window_bounds = array<i64: 8, 128>}]} {
    %c0 = arith.constant 0 : index
    %c0_0 = arith.constant 0 : index
    %0 = vector.load %arg1[%c0, %c0_0] : memref<8x128xf32, #tpu.memory_space<vmem>>, vector<8x128xf32>
    %c0_1 = arith.constant 0 : index
    %c0_2 = arith.constant 0 : index
    %1 = vector.load %arg2[%c0_1, %c0_2] : memref<8x128xf32, #tpu.memory_space<vmem>>, vector<8x128xf32>
    tpu.vector_store %arg2[%c0_1, %c0_2], %0 {strides = array<i32>} : memref<8x128xf32, #tpu.memory_space<vmem>>, vector<8x128xf32>,
    return
  }
  func.func @transform_0(%arg0: i32) -> (i32, i32) {
    %c0_i32 = arith.constant 0 : i32
    %c0_i32_0 = arith.constant 0 : i32
    %c0_i32_1 = arith.constant 0 : i32
    return %c0_i32, %c0_i32_0 : i32, i32
  }
  func.func @transform_1(%arg0: i32) -> (i32, i32) {
    %c0_i32 = arith.constant 0 : i32
    %c0_i32_0 = arith.constant 0 : i32
    %c0_i32_1 = arith.constant 0 : i32
    return %c0_i32, %c0_i32_0 : i32, i32
  }
}

module attributes {stable_mosaic.version = 11 : i64} {
  func.func @_downsample_fused_kernel(%arg0: i32, %arg1: i32, %arg2: memref<1x4x64x4xbf16, #tpu.memory_space<vmem>>, %arg3: memref<4x4xbf16, #tpu.memory_space<vmem>>, %arg4: memref<4x4xbf16, #tpu.memory_space<vmem>>, %arg5: memref<3x12x4xbf16, #tpu.memory_space<vmem>>, %arg6: memref<1x4xf32, #tpu.memory_space<vmem>>, %arg7: memref<1x4xf32, #tpu.memory_space<vmem>>, %arg8: memref<1x4xf32, #tpu.memory_space<vmem>>, %arg9: memref<1x2x64x4xbf16, #tpu.memory_space<vmem>>, %arg10: memref<8x12xbf16, #tpu.memory_space<vmem>>) attributes {dimension_semantics = [#tpu.dimension_semantics<parallel>, #tpu.dimension_semantics<arbitrary>], iteration_bounds = array<i64: 2, 1>, scalar_prefetch = 0 : i64, scratch_operands = 1 : i64, tpu.core_type = #tpu.core_type<tc>, window_params = [{transform_indices = @transform_0, window_bounds = array<i64: 1, 4, 64, 4>}, {pipeline_mode = #tpu.pipeline_mode<synchronous>, transform_indices = @transform_1, window_bounds = array<i64: 4, 4>}, {pipeline_mode = #tpu.pipeline_mode<synchronous>, transform_indices = @transform_2, window_bounds = array<i64: 4, 4>}, {pipeline_mode = #tpu.pipeline_mode<synchronous>, transform_indices = @transform_3, window_bounds = array<i64: 3, 12, 4>}, {pipeline_mode = #tpu.pipeline_mode<synchronous>, transform_indices = @transform_4, window_bounds = array<i64: 1, 4>}, {pipeline_mode = #tpu.pipeline_mode<synchronous>, transform_indices = @transform_5, window_bounds = array<i64: 1, 4>}, {pipeline_mode = #tpu.pipeline_mode<synchronous>, transform_indices = @transform_6, window_bounds = array<i64: 1, 4>}, {transform_indices = @transform_7, window_bounds = array<i64: 1, 2, 64, 4>}]} {
    %c0_i32 = arith.constant 0 : i32
    %0 = arith.cmpi eq, %arg1, %c0_i32 : i32
    %1 = arith.extui %0 : i1 to i32
    %c0_i32_0 = arith.constant 0 : i32
    %2 = arith.cmpi ne, %1, %c0_i32_0 : i32
    scf.if %2 {
      %cst_64 = arith.constant 0.000000e+00 : bf16
      %112 = vector.broadcast %cst_64 : bf16 to vector<8x12xbf16>
      %c0_65 = arith.constant 0 : index
      %c0_66 = arith.constant 0 : index
      %113 = vector.load %arg10[%c0_65, %c0_66] : memref<8x12xbf16, #tpu.memory_space<vmem>>, vector<8x12xbf16>
      tpu.vector_store %arg10[%c0_65, %c0_66], %112 {strides = array<i32>} : memref<8x12xbf16, #tpu.memory_space<vmem>>, vector<8x12xbf16>,
    } else {
    }
    %c0 = arith.constant 0 : index
    %c0_1 = arith.constant 0 : index
    %c0_2 = arith.constant 0 : index
    %c0_3 = arith.constant 0 : index
    %3 = vector.load %arg2[%c0, %c0_1, %c0_2, %c0_3] : memref<1x4x64x4xbf16, #tpu.memory_space<vmem>>, vector<1x1x64x4xbf16>
    %4 = vector.shape_cast %3 : vector<1x1x64x4xbf16> to vector<64x4xbf16>
    %c0_4 = arith.constant 0 : index
    %c1 = arith.constant 1 : index
    %c0_5 = arith.constant 0 : index
    %c0_6 = arith.constant 0 : index
    %5 = vector.load %arg2[%c0_4, %c1, %c0_5, %c0_6] : memref<1x4x64x4xbf16, #tpu.memory_space<vmem>>, vector<1x1x64x4xbf16>
    %6 = vector.shape_cast %5 : vector<1x1x64x4xbf16> to vector<64x4xbf16>
    %c0_7 = arith.constant 0 : index
    %c2 = arith.constant 2 : index
    %c0_8 = arith.constant 0 : index
    %c0_9 = arith.constant 0 : index
    %7 = vector.load %arg2[%c0_7, %c2, %c0_8, %c0_9] : memref<1x4x64x4xbf16, #tpu.memory_space<vmem>>, vector<1x1x64x4xbf16>
    %8 = vector.shape_cast %7 : vector<1x1x64x4xbf16> to vector<64x4xbf16>
    %c0_10 = arith.constant 0 : index
    %c3 = arith.constant 3 : index
    %c0_11 = arith.constant 0 : index
    %c0_12 = arith.constant 0 : index
    %9 = vector.load %arg2[%c0_10, %c3, %c0_11, %c0_12] : memref<1x4x64x4xbf16, #tpu.memory_space<vmem>>, vector<1x1x64x4xbf16>
    %10 = vector.shape_cast %9 : vector<1x1x64x4xbf16> to vector<64x4xbf16>
    %11 = arith.maximumf %4, %6 : vector<64x4xbf16>
    %12 = arith.maximumf %8, %10 : vector<64x4xbf16>
    %13 = arith.maximumf %11, %12 : vector<64x4xbf16>
    %c0_13 = arith.constant 0 : index
    %c0_14 = arith.constant 0 : index
    %14 = vector.load %arg3[%c0_13, %c0_14] : memref<4x4xbf16, #tpu.memory_space<vmem>>, vector<4x4xbf16>
    %cst = arith.constant dense<0.000000e+00> : vector<64x4xf32>
    %15 = tpu.matmul %13, %14, %cst {dimension_numbers = #tpu.dot_dimension_numbers<[1], [0], [0], [1], [0, 0, 1, 1], [], []>} : vector<64x4xbf16>, vector<4x4xbf16>, vector<64x4xf32> -> vector<64x4xf32>
    %c0_15 = arith.constant 0 : index
    %c0_16 = arith.constant 0 : index
    %16 = vector.load %arg6[%c0_15, %c0_16] : memref<1x4xf32, #tpu.memory_space<vmem>>, vector<1x4xf32>
    %17 = vector.broadcast %16 : vector<1x4xf32> to vector<64x4xf32>
    %18 = arith.addf %15, %17 : vector<64x4xf32>
    %19 = arith.negf %18 : vector<64x4xf32>
    %20 = math.exp %19 : vector<64x4xf32>
    %cst_17 = arith.constant 1.000000e+00 : f32
    %21 = vector.broadcast %cst_17 : f32 to vector<64x4xf32>
    %22 = arith.addf %21, %20 : vector<64x4xf32>
    %23 = arith.divf %21, %22 : vector<64x4xf32>
    %24 = arith.mulf %18, %23 : vector<64x4xf32>
    %25 = arith.truncf %24 : vector<64x4xf32> to vector<64x4xbf16>
    %c0_18 = arith.constant 0 : index
    %c0_19 = arith.constant 0 : index
    %c0_20 = arith.constant 0 : index
    %c0_21 = arith.constant 0 : index
    %26 = vector.load %arg9[%c0_18, %c0_19, %c0_20, %c0_21] : memref<1x2x64x4xbf16, #tpu.memory_space<vmem>>, vector<1x1x64x4xbf16>
    %27 = vector.shape_cast %26 : vector<1x1x64x4xbf16> to vector<64x4xbf16>
    %28 = vector.shape_cast %25 : vector<64x4xbf16> to vector<1x1x64x4xbf16>
    tpu.vector_store %arg9[%c0_18, %c0_19, %c0_20, %c0_21], %28 {strides = array<i32>} : memref<1x2x64x4xbf16, #tpu.memory_space<vmem>>, vector<1x1x64x4xbf16>,
    %c0_22 = arith.constant 0 : index
    %c0_23 = arith.constant 0 : index
    %c0_24 = arith.constant 0 : index
    %c0_25 = arith.constant 0 : index
    %29 = vector.load %arg2[%c0_22, %c0_23, %c0_24, %c0_25] : memref<1x4x64x4xbf16, #tpu.memory_space<vmem>>, vector<1x4x64x4xbf16>
    %30 = vector.shape_cast %29 : vector<1x4x64x4xbf16> to vector<4x64x4xbf16>
    %31 = vector.shape_cast %30 : vector<4x64x4xbf16> to vector<256x4xbf16>
    %c0_26 = arith.constant 0 : index
    %c0_27 = arith.constant 0 : index
    %32 = vector.load %arg4[%c0_26, %c0_27] : memref<4x4xbf16, #tpu.memory_space<vmem>>, vector<4x4xbf16>
    %cst_28 = arith.constant dense<0.000000e+00> : vector<256x4xf32>
    %33 = tpu.matmul %31, %32, %cst_28 {dimension_numbers = #tpu.dot_dimension_numbers<[1], [0], [0], [1], [0, 0, 1, 1], [], []>} : vector<256x4xbf16>, vector<4x4xbf16>, vector<256x4xf32> -> vector<256x4xf32>
    %c0_29 = arith.constant 0 : index
    %c0_30 = arith.constant 0 : index
    %34 = vector.load %arg7[%c0_29, %c0_30] : memref<1x4xf32, #tpu.memory_space<vmem>>, vector<1x4xf32>
    %35 = vector.broadcast %34 : vector<1x4xf32> to vector<256x4xf32>
    %36 = arith.addf %33, %35 : vector<256x4xf32>
    %37 = arith.negf %36 : vector<256x4xf32>
    %38 = math.exp %37 : vector<256x4xf32>
    %cst_31 = arith.constant 1.000000e+00 : f32
    %39 = vector.broadcast %cst_31 : f32 to vector<256x4xf32>
    %40 = arith.addf %39, %38 : vector<256x4xf32>
    %41 = arith.divf %39, %40 : vector<256x4xf32>
    %42 = arith.mulf %36, %41 : vector<256x4xf32>
    %43 = arith.truncf %42 : vector<256x4xf32> to vector<256x4xbf16>
    %44 = vector.extract_strided_slice %43 {offsets = [0, 0], sizes = [64, 4], strides = [1, 1]} : vector<256x4xbf16> to vector<64x4xbf16>
    %45 = vector.extract_strided_slice %43 {offsets = [64, 0], sizes = [64, 4], strides = [1, 1]} : vector<256x4xbf16> to vector<64x4xbf16>
    %46 = vector.extract_strided_slice %43 {offsets = [128, 0], sizes = [64, 4], strides = [1, 1]} : vector<256x4xbf16> to vector<64x4xbf16>
    %47 = vector.extract_strided_slice %43 {offsets = [192, 0], sizes = [64, 4], strides = [1, 1]} : vector<256x4xbf16> to vector<64x4xbf16>
    %48 = tpu.iota {dimensions = array<i32: 0>} : vector<64x1xi32>
    %c8_i32 = arith.constant 8 : i32
    %c0_i32_32 = arith.constant 0 : i32
    %49 = arith.cmpi eq, %c8_i32, %c0_i32_32 : i32
    %c1_i32 = arith.constant 1 : i32
    %50 = arith.select %49, %c1_i32, %c8_i32 : i32
    %51 = vector.broadcast %50 : i32 to vector<64x1xi32>
    %52 = arith.remsi %48, %51 : vector<64x1xi32>
    %c0_i32_33 = arith.constant 0 : i32
    %53 = vector.broadcast %c0_i32_33 : i32 to vector<64x1xi32>
    %54 = arith.cmpi ne, %52, %53 : vector<64x1xi32>
    %c0_i32_34 = arith.constant 0 : i32
    %55 = vector.broadcast %c0_i32_34 : i32 to vector<64x1xi32>
    %56 = arith.cmpi slt, %52, %55 : vector<64x1xi32>
    %c0_i32_35 = arith.constant 0 : i32
    %57 = arith.cmpi slt, %50, %c0_i32_35 : i32
    %58 = vector.broadcast %57 : i1 to vector<64x1xi1>
    %59 = vector.broadcast %58 : vector<64x1xi1> to vector<64x1xi1>
    %60 = arith.xori %56, %59 : vector<64x1xi1>
    %61 = arith.andi %60, %54 : vector<64x1xi1>
    %62 = vector.broadcast %50 : i32 to vector<64x1xi32>
    %63 = arith.addi %52, %62 : vector<64x1xi32>
    %64 = arith.select %61, %63, %52 : vector<64x1xi1>, vector<64x1xi32>
    %c0_i32_36 = arith.constant 0 : i32
    %65 = vector.broadcast %c0_i32_36 : i32 to vector<64x1xi32>
    %66 = arith.cmpi eq, %64, %65 : vector<64x1xi32>
    %67 = vector.extract_strided_slice %42 {offsets = [64, 0], sizes = [64, 4], strides = [1, 1]} : vector<256x4xf32> to vector<64x4xf32>
    %c1_i32_37 = arith.constant 1 : i32
    %68 = tpu.dynamic_rotate %67 by %c1_i32_37 dim 0 : vector<64x4xf32>, i32 -> vector<64x4xf32>
    %cst_38 = arith.constant 0.000000e+00 : f32
    %69 = vector.broadcast %cst_38 : f32 to vector<64x4xf32>
    %70 = vector.shape_cast %66 : vector<64x1xi1> to vector<64x1xi1>
    %71 = vector.broadcast %70 : vector<64x1xi1> to vector<64x4xi1>
    %72 = arith.select %71, %69, %68 : vector<64x4xi1>, vector<64x4xf32>
    %73 = arith.truncf %72 : vector<64x4xf32> to vector<64x4xbf16>
    %74 = vector.extract_strided_slice %42 {offsets = [192, 0], sizes = [64, 4], strides = [1, 1]} : vector<256x4xf32> to vector<64x4xf32>
    %c1_i32_39 = arith.constant 1 : i32
    %75 = tpu.dynamic_rotate %74 by %c1_i32_39 dim 0 : vector<64x4xf32>, i32 -> vector<64x4xf32>
    %cst_40 = arith.constant 0.000000e+00 : f32
    %76 = vector.broadcast %cst_40 : f32 to vector<64x4xf32>
    %77 = vector.shape_cast %66 : vector<64x1xi1> to vector<64x1xi1>
    %78 = vector.broadcast %77 : vector<64x1xi1> to vector<64x4xi1>
    %79 = arith.select %78, %76, %75 : vector<64x4xi1>, vector<64x4xf32>
    %80 = arith.truncf %79 : vector<64x4xf32> to vector<64x4xbf16>
    %81 = tpu.concatenate %73, %44, %45 in 1 : vector<64x4xbf16>, vector<64x4xbf16>, vector<64x4xbf16> -> vector<64x12xbf16>
    %82 = tpu.concatenate %80, %46, %47 in 1 : vector<64x4xbf16>, vector<64x4xbf16>, vector<64x4xbf16> -> vector<64x12xbf16>
    %c0_41 = arith.constant 0 : index
    %c0_42 = arith.constant 0 : index
    %83 = vector.load %arg10[%c0_41, %c0_42] : memref<8x12xbf16, #tpu.memory_space<vmem>>, vector<8x12xbf16>
    %84 = vector.extract_strided_slice %82 {offsets = [0, 0], sizes = [56, 12], strides = [1, 1]} : vector<64x12xbf16> to vector<56x12xbf16>
    %85 = tpu.concatenate %83, %84 in 0 : vector<8x12xbf16>, vector<56x12xbf16> -> vector<64x12xbf16>
    %86 = vector.extract_strided_slice %82 {offsets = [56, 0], sizes = [8, 12], strides = [1, 1]} : vector<64x12xbf16> to vector<8x12xbf16>
    %c0_43 = arith.constant 0 : index
    %c0_44 = arith.constant 0 : index
    %87 = vector.load %arg10[%c0_43, %c0_44] : memref<8x12xbf16, #tpu.memory_space<vmem>>, vector<8x12xbf16>
    tpu.vector_store %arg10[%c0_43, %c0_44], %86 {strides = array<i32>} : memref<8x12xbf16, #tpu.memory_space<vmem>>, vector<8x12xbf16>,
    %c1_45 = arith.constant 1 : index
    %c0_46 = arith.constant 0 : index
    %c0_47 = arith.constant 0 : index
    %88 = vector.load %arg5[%c1_45, %c0_46, %c0_47] : memref<3x12x4xbf16, #tpu.memory_space<vmem>>, vector<1x12x4xbf16>
    %89 = vector.shape_cast %88 : vector<1x12x4xbf16> to vector<12x4xbf16>
    %cst_48 = arith.constant dense<0.000000e+00> : vector<64x4xf32>
    %90 = tpu.matmul %81, %89, %cst_48 {dimension_numbers = #tpu.dot_dimension_numbers<[1], [0], [0], [1], [0, 0, 1, 1], [], []>} : vector<64x12xbf16>, vector<12x4xbf16>, vector<64x4xf32> -> vector<64x4xf32>
    %c2_49 = arith.constant 2 : index
    %c0_50 = arith.constant 0 : index
    %c0_51 = arith.constant 0 : index
    %91 = vector.load %arg5[%c2_49, %c0_50, %c0_51] : memref<3x12x4xbf16, #tpu.memory_space<vmem>>, vector<1x12x4xbf16>
    %92 = vector.shape_cast %91 : vector<1x12x4xbf16> to vector<12x4xbf16>
    %cst_52 = arith.constant dense<0.000000e+00> : vector<64x4xf32>
    %93 = tpu.matmul %82, %92, %cst_52 {dimension_numbers = #tpu.dot_dimension_numbers<[1], [0], [0], [1], [0, 0, 1, 1], [], []>} : vector<64x12xbf16>, vector<12x4xbf16>, vector<64x4xf32> -> vector<64x4xf32>
    %94 = arith.addf %90, %93 : vector<64x4xf32>
    %c0_53 = arith.constant 0 : index
    %c0_54 = arith.constant 0 : index
    %c0_55 = arith.constant 0 : index
    %95 = vector.load %arg5[%c0_53, %c0_54, %c0_55] : memref<3x12x4xbf16, #tpu.memory_space<vmem>>, vector<1x12x4xbf16>
    %96 = vector.shape_cast %95 : vector<1x12x4xbf16> to vector<12x4xbf16>
    %cst_56 = arith.constant dense<0.000000e+00> : vector<64x4xf32>
    %97 = tpu.matmul %85, %96, %cst_56 {dimension_numbers = #tpu.dot_dimension_numbers<[1], [0], [0], [1], [0, 0, 1, 1], [], []>} : vector<64x12xbf16>, vector<12x4xbf16>, vector<64x4xf32> -> vector<64x4xf32>
    %98 = arith.addf %94, %97 : vector<64x4xf32>
    %c0_57 = arith.constant 0 : index
    %c0_58 = arith.constant 0 : index
    %99 = vector.load %arg8[%c0_57, %c0_58] : memref<1x4xf32, #tpu.memory_space<vmem>>, vector<1x4xf32>
    %100 = vector.broadcast %99 : vector<1x4xf32> to vector<64x4xf32>
    %101 = arith.addf %98, %100 : vector<64x4xf32>
    %102 = arith.negf %101 : vector<64x4xf32>
    %103 = math.exp %102 : vector<64x4xf32>
    %cst_59 = arith.constant 1.000000e+00 : f32
    %104 = vector.broadcast %cst_59 : f32 to vector<64x4xf32>
    %105 = arith.addf %104, %103 : vector<64x4xf32>
    %106 = arith.divf %104, %105 : vector<64x4xf32>
    %107 = arith.mulf %101, %106 : vector<64x4xf32>
    %108 = arith.truncf %107 : vector<64x4xf32> to vector<64x4xbf16>
    %c0_60 = arith.constant 0 : index
    %c1_61 = arith.constant 1 : index
    %c0_62 = arith.constant 0 : index
    %c0_63 = arith.constant 0 : index
    %109 = vector.load %arg9[%c0_60, %c1_61, %c0_62, %c0_63] : memref<1x2x64x4xbf16, #tpu.memory_space<vmem>>, vector<1x1x64x4xbf16>
    %110 = vector.shape_cast %109 : vector<1x1x64x4xbf16> to vector<64x4xbf16>
    %111 = vector.shape_cast %108 : vector<64x4xbf16> to vector<1x1x64x4xbf16>
    tpu.vector_store %arg9[%c0_60, %c1_61, %c0_62, %c0_63], %111 {strides = array<i32>} : memref<1x2x64x4xbf16, #tpu.memory_space<vmem>>, vector<1x1x64x4xbf16>,
    return
  }
  func.func @transform_0(%arg0: i32, %arg1: i32) -> (i32, i32, i32, i32) {
    %c0_i32 = arith.constant 0 : i32
    %c0_i32_0 = arith.constant 0 : i32
    %c0_i32_1 = arith.constant 0 : i32
    return %arg0, %c0_i32, %arg1, %c0_i32_0 : i32, i32, i32, i32
  }
  func.func @transform_1(%arg0: i32, %arg1: i32) -> (i32, i32) {
    %c0_i32 = arith.constant 0 : i32
    %c0_i32_0 = arith.constant 0 : i32
    %c0_i32_1 = arith.constant 0 : i32
    return %c0_i32, %c0_i32_0 : i32, i32
  }
  func.func @transform_2(%arg0: i32, %arg1: i32) -> (i32, i32) {
    %c0_i32 = arith.constant 0 : i32
    %c0_i32_0 = arith.constant 0 : i32
    %c0_i32_1 = arith.constant 0 : i32
    return %c0_i32, %c0_i32_0 : i32, i32
  }
  func.func @transform_3(%arg0: i32, %arg1: i32) -> (i32, i32, i32) {
    %c0_i32 = arith.constant 0 : i32
    %c0_i32_0 = arith.constant 0 : i32
    %c0_i32_1 = arith.constant 0 : i32
    %c0_i32_2 = arith.constant 0 : i32
    return %c0_i32, %c0_i32_0, %c0_i32_1 : i32, i32, i32
  }
  func.func @transform_4(%arg0: i32, %arg1: i32) -> (i32, i32) {
    %c0_i32 = arith.constant 0 : i32
    %c0_i32_0 = arith.constant 0 : i32
    %c0_i32_1 = arith.constant 0 : i32
    return %c0_i32, %c0_i32_0 : i32, i32
  }
  func.func @transform_5(%arg0: i32, %arg1: i32) -> (i32, i32) {
    %c0_i32 = arith.constant 0 : i32
    %c0_i32_0 = arith.constant 0 : i32
    %c0_i32_1 = arith.constant 0 : i32
    return %c0_i32, %c0_i32_0 : i32, i32
  }
  func.func @transform_6(%arg0: i32, %arg1: i32) -> (i32, i32) {
    %c0_i32 = arith.constant 0 : i32
    %c0_i32_0 = arith.constant 0 : i32
    %c0_i32_1 = arith.constant 0 : i32
    return %c0_i32, %c0_i32_0 : i32, i32
  }
  func.func @transform_7(%arg0: i32, %arg1: i32) -> (i32, i32, i32, i32) {
    %c0_i32 = arith.constant 0 : i32
    %c0_i32_0 = arith.constant 0 : i32
    %c0_i32_1 = arith.constant 0 : i32
    return %arg0, %c0_i32, %arg1, %c0_i32_0 : i32, i32, i32, i32
  }
}

</mosaic_0001>

<bundles_post_ra>
// kernel: tpu_custom_call.1
= control target key start
LH: loop header
LB: loop body
LE: loop exit
PB: predicated region body
PF: predicated region fallthrough
CT: control target
= control target key end

     0   :  { %6 = vsyncpa [#allocation3], 0  ;;  %s114_s0 = inlined_call_operand.hbm [shape: f32[8,128], index: 0, kind: input, shape index: {}]   ;;  %s115_s1 = inlined_call_operand.hbm [shape: f32[8,128], index: 1, kind: output, shape index: {}]  }
   0x1   :  { %7 = vsyncpa [#allocation4], 0  ;;  %s13_s8 = sshll.u32 %s114_s0, 4  ;;  %s96_s9 = smov [#allocation2]   ;;  %s14_s8 = int_to_ptr.hbm [resolvable:$true] %s13_s8 }
   0x2   :  { %s15_s10 = sshll.u32 %s96_s9, 4  ;;  %s16_s10 = int_to_ptr.vmem [resolvable:$true] %s15_s10 }
   0x3   :  { %18 = dma.hbm_to_vmem [thread:$0]  %s14_s8, 128, %s16_s10, [#allocation3]  }
   0x4   :  { %92 = dma.done.wait [#allocation3], 128  }
   0x5   :  { %93 = vsyncadd [#allocation3], 4294967168  ;;  %s97_s11 = smov [#allocation5]   ;;  %s32_s15 = sshll.u32 %s115_s1, 4  ;;  %v23_v0 = vld [vmem:[#allocation2] sm:$0xff]  ;;  %s33_s15 = int_to_ptr.hbm [resolvable:$true] %s32_s15 }
   0x6   :  { %s30_s12 = sshll.u32 %s97_s11, 4  ;;  %24 = vst [vmem:[#allocation5] sm:$0xff] %v23_v0  ;;  %s31_s12 = int_to_ptr.vmem [resolvable:$true] %s30_s12 }
   0x7   :  { %35 = dma.vmem_to_hbm [thread:$0]  %s31_s12, 128, %s33_s15, [#allocation4]  }
   0x8   :  { %94 = dma.done.wait [#allocation4], 128  }
   0x9   :  { %95 = vsyncadd [#allocation4], 4294967168 }
   0xa   :  { %40 = vsyncpa [#allocation3], 1 }
   0xb   :  { %41 = vsyncpa [#allocation4], 1 }

// kernel: downsample_forward.1
= control target key start
LH: loop header
LB: loop body
LE: loop exit
PB: predicated region body
PF: predicated region fallthrough
CT: control target
= control target key end

     0   :  { %s3045_s24 = smov 0   ;;  %s3047_s25 = smov 0   ;;  %s4533_s0 = inlined_call_operand.vmem [shape: bf16[2,4,64,4], index: 0, kind: input, shape index: {}]   ;;  %s4534_s1 = inlined_call_operand.vmem [shape: bf16[4,4], index: 1, kind: input, shape index: {}]   ;;  %s4535_s2 = inlined_call_operand.vmem [shape: bf16[4,4], index: 2, kind: input, shape index: {}]   ;;  %s4536_s3 = inlined_call_operand.vmem [shape: bf16[3,12,4], index: 3, kind: input, shape index: {}]   ;;  %s4537_s4 = inlined_call_operand.vmem [shape: f32[1,4], index: 4, kind: input, shape index: {}]   ;;  %s4538_s5 = inlined_call_operand.vmem [shape: f32[1,4], index: 5, kind: input, shape index: {}]   ;;  %s4539_s6 = inlined_call_operand.vmem [shape: f32[1,4], index: 6, kind: input, shape index: {}]   ;;  %s4540_s7 = inlined_call_operand.vmem [shape: bf16[2,2,64,4], index: 7, kind: output, shape index: {}]  }
   0x1   :  { %s3049_s26 = smov 0  }
   0x2 LB: > { %s29_s27 = sadd.s32 1, %s2996_s25  ;;  %p2454_p0 = scmp.ge.s32.totalorder %s3000_s26, 1  ;;  %s3000_s26 = sphi %s3049_s26, %s17_s26   ;;  %s2996_s25 = sphi %s3047_s25, %s4662_s25   ;;  %s2992_s24 = sphi %s3045_s24, %s4661_s24  }
   0x3   : > { %p31_p1 = scmp.ge.s32.totalorder %s29_s27, 2  ;;  %p258_p2 = scmp.lt.s32.totalorder %s3000_s26, 3 }
   0x5   : > { %s4664_s27 = smov (%p31_p1, %s29_s27), 0  ;;  %p259_p3 = pnand %p2454_p0, %p258_p2 }
   0x6   : > { %p299_p4 = scmp.lt.s32.totalorder (!%p259_p3), %s2992_s24, 1  ;;  %s3002_s13 = smov (!%p259_p3), 4  }
   0x7   : > { %262 = sbr.rel (%p259_p3) target bundleno = 659 (0x293), region = 48  ;;  %s3003_s16 = smov (!%p259_p3), 8  }
   0xc   : > { %vm470_vm0 = vcmask 1041408   ;;  %v712_v0 = vld [vmem:[%s4535_s2] sm:$0x3]  ;;  %s4666_s24 = smov (!%p299_p4, %s2992_s24), 1  ;;  %vm457_vm1 = vcmask 31744   ;;  %v1609_v47 = vlaneseq }
   0xd   : > { %v846_v1 = vsel %vm470_vm0, %v712_v0, 0  ;;  %s2653_s30 = sshll.u32 %s4666_s24, 7  ;;  %v3110_v18 = vld [vmem:[%s4538_s5] ss:$0 sm:$0xff]  ;;  %s2654_s14 = sshll.u32 %s4666_s24, 6 }
   0xe   : > { %855 = vmatpush.bf16.msra.mxu1 %v846_v1  ;;  %2754 = vmatpush.bf16.msra.mxu3 %v846_v1  ;;  %s3073_s10 = scalar_lea.vmem %s4533_s0, %s2653_s30  ;;  %v3155_v58 = vshrl.u32 %v1609_v47, 7  ;;  %s4419_s17 = scalar_lea.vmem %s4540_s7, %s2654_s14 }
   0xf   : > { %2753 = vmatpush.bf16.msra.mxu2 %v846_v1  ;;  %v2655_v2 = vld [vmem:[%s3073_s10] sm:$0xff]  ;;  %v2656_v5 = vld [vmem:[%s3073_s10 + $0x8] sm:$0xff]  ;;  %v2657_v8 = vld [vmem:[%s3073_s10 + $0x10] sm:$0xff] }
  0x10   : > { %v2667_v3 = vld [vmem:[%s3073_s10 + $0x60] sm:$0xff]  ;;  %v2668_v6 = vld [vmem:[%s3073_s10 + $0x68] sm:$0xff]  ;;  %v2669_v9 = vld [vmem:[%s3073_s10 + $0x70] sm:$0xff] }
  0x11   : > { %v2663_v4 = vld [vmem:[%s3073_s10 + $0x40] sm:$0xff]  ;;  %2559 = vmatmul.msk.bf16.vlgmr.msra.gmra.mxu1 %vm457_vm1, %v2655_v2  ;;  %2571 = vmatmul.msk.bf16.vlgmr.msra.gmra.mxu3 %vm457_vm1, %v2667_v3  ;;  %v2664_v7 = vld [vmem:[%s3073_s10 + $0x48] sm:$0xff]  ;;  %v2665_v10 = vld [vmem:[%s3073_s10 + $0x50] sm:$0xff] }
  0x12   : > { %2567 = vmatmul.msk.bf16.vlgmr.msra.gmra.mxu2 %vm457_vm1, %v2663_v4  ;;  %v2658_v11 = vld [vmem:[%s3073_s10 + $0x18] sm:$0xff]  ;;  %v2659_v14 = vld [vmem:[%s3073_s10 + $0x20] sm:$0xff]  ;;  %v2660_v15 = vld [vmem:[%s3073_s10 + $0x28] sm:$0xff] }
  0x13   : > { %v2670_v12 = vld [vmem:[%s3073_s10 + $0x78] sm:$0xff]  ;;  %v2661_v16 = vld [vmem:[%s3073_s10 + $0x30] sm:$0xff] }
  0x14   : > { %v2666_v13 = vld [vmem:[%s3073_s10 + $0x58] sm:$0xff] }
  0x15   : > { %v2662_v17 = vld [vmem:[%s3073_s10 + $0x38] sm:$0xff] }
  0x21   : > { %2560 = vmatmul.msk.bf16.gmra.mxu1 %vm457_vm1, %v2656_v5  ;;  %2572 = vmatmul.msk.bf16.gmra.mxu3 %vm457_vm1, %v2668_v6 }
  0x22   : > { %2568 = vmatmul.msk.bf16.gmra.mxu2 %vm457_vm1, %v2664_v7 }
  0x31   : > { %2561 = vmatmul.msk.bf16.gmra.mxu1 %vm457_vm1, %v2657_v8  ;;  %2573 = vmatmul.msk.bf16.gmra.mxu3 %vm457_vm1, %v2669_v9 }
  0x32   : > { %2569 = vmatmul.msk.bf16.gmra.mxu2 %vm457_vm1, %v2665_v10 }
  0x41   : > { %2562 = vmatmul.msk.bf16.gmra.mxu1 %vm457_vm1, %v2658_v11  ;;  %2574 = vmatmul.msk.bf16.gmra.mxu3 %vm457_vm1, %v2670_v12 }
  0x42   : > { %2570 = vmatmul.msk.bf16.gmra.mxu2 %vm457_vm1, %v2666_v13 }
  0x51   : > { %2563 = vmatmul.msk.bf16.gmra.mxu1 %vm457_vm1, %v2659_v14 }
  0x61   : > { %2564 = vmatmul.msk.bf16.gmra.mxu1 %vm457_vm1, %v2660_v15 }
  0x71   : > { %2565 = vmatmul.msk.bf16.gmra.mxu1 %vm457_vm1, %v2661_v16 }
  0x81   : > { %2566 = vmatmul.msk.bf16.gmra.mxu1 %vm457_vm1, %v2662_v17 }
  0x8e   : > { %v857_v19 = vpop.f32.mrf.mxu1 }
  0x8f   : > { %v3113_v20 = vadd.f32 %v3110_v18, %v857_v19 }
  0x91   : > { %v2575_v21 = vmul.f32 -1.442695, %v3113_v20 }
  0x93   : > { %2785 = vpow2.f32 %v2575_v21 }
  0x94   : > { %v917_v22 = vpop.f32.mrf.mxu3 }
  0x95   : > { %v3117_v23 = vadd.f32 %v3110_v18, %v917_v22  ;;  %v897_v24 = vpop.f32.mrf.mxu2 }
  0x96   : > { %v859_v25 = vpop.f32.mrf.mxu1  ;;  %v3120_v26 = vadd.f32 %v3110_v18, %v897_v24 }
  0x97   : > { %v2599_v27 = vmul.f32 -1.442695, %v3117_v23  ;;  %v3124_v28 = vadd.f32 %v3110_v18, %v859_v25 }
  0x98   : > { %v2591_v29 = vmul.f32 -1.442695, %v3120_v26 }
  0x99   : > { %v2786_v30 = vpop.eup %2785  ;;  %2787 = vpow2.f32 %v2599_v27  ;;  %v2576_v31 = vmul.f32 -1.442695, %v3124_v28 }
  0x9a   : > { %v1033_v32 = vadd.f32 1.0, %v2786_v30  ;;  %2789 = vpow2.f32 %v2591_v29 }
  0x9b   : > { %2791 = vpow2.f32 %v2576_v31 }
  0x9c   : > { %2793 = vrcp.f32 %v1033_v32  ;;  %v919_v33 = vpop.f32.mrf.mxu3  ;;  %v1074_v42 = vand.u32 2147483647, %v1033_v32  ;;  %v1076_v45 = vand.u32 2147483648, %v1033_v32  ;;  %vm1070_vm2 = vweird.f32 %v1033_v32 }
  0x9d   : > { %v3129_v34 = vadd.f32 %v3110_v18, %v919_v33  ;;  %v899_v35 = vpop.f32.mrf.mxu2 }
  0x9e   : > { %v862_v36 = vpop.f32.mrf.mxu1  ;;  %v3132_v37 = vadd.f32 %v3110_v18, %v899_v35  ;;  %vm3150_vm3 = vcmp.eq.f32.partialorder %v1074_v42, 8.507059e+37  ;;  %v1077_v57 = vor.u32 1.1754944e-38, %v1076_v45 }
  0x9f   : > { %v2788_v38 = vpop.eup %2787  ;;  %v2600_v39 = vmul.f32 -1.442695, %v3129_v34  ;;  %v3136_v40 = vadd.f32 %v3110_v18, %v862_v36 }
  0xa0   : > { %v2790_v41 = vpop.eup %2789  ;;  %v3138_v43 = vadd.f32 1.0, %v2788_v38  ;;  %v2592_v50 = vmul.f32 -1.442695, %v3132_v37 }
  0xa1   : > { %v2792_v44 = vpop.eup %2791  ;;  %v3140_v46 = vadd.f32 1.0, %v2790_v41  ;;  %2795 = vpow2.f32 %v2600_v39  ;;  %v2577_v49 = vmul.f32 -1.442695, %v3136_v40 }
  0xa2   : > { %v2794_v48 = vpop.eup %2793  ;;  %2797 = vrcp.f32 %v3138_v43  ;;  %v1434_v52 = vand.u32 2147483647, %v3138_v43  ;;  %v3146_v53 = vadd.f32 1.0, %v2792_v44  ;;  %v1436_v54 = vand.u32 2147483648, %v3138_v43 }
  0xa3   : > { %v1066_v51 = vmul.f32 %v2794_v48, %v1033_v32  ;;  %2799 = vrcp.f32 %v3140_v46  ;;  %vm1071_vm4 = vweird.f32 %v2794_v48  ;;  %vm1430_vm5 = vweird.f32 %v3138_v43 }
  0xa4   : > { %2801 = vrcp.f32 %v3146_v53  ;;  %v1314_v59 = vand.u32 2147483647, %v3140_v46  ;;  %v922_v60 = vpop.f32.mrf.mxu3  ;;  %vm3159_vm6 = vcmp.eq.f32.partialorder %v1434_v52, 8.507059e+37  ;;  %v1437_v2 = vor.u32 1.1754944e-38, %v1436_v54  ;;  %vm3175_vm8 = vmor %vm1070_vm2, %vm1071_vm4 }
  0xa5   : > { %v1067_v55 = vsub.f32 1.0, %v1066_v51  ;;  %2803 = vpow2.f32 %v2577_v49  ;;  %v3164_v0 = vadd.f32 %v3110_v18, %v922_v60  ;;  %v1089_v3 = vand.u32 2147483647, %v3146_v53 }
  0xa6   : > { %2805 = vpow2.f32 %v2592_v50  ;;  %v1091_v4 = vand.u32 2147483648, %v3146_v53  ;;  %vm1310_vm7 = vweird.f32 %v3140_v46  ;;  %v1316_v9 = vand.u32 2147483648, %v3140_v46  ;;  %v864_v13 = vpop.f32.mrf.mxu1 }
  0xa7   : > { %v2796_v61 = vpop.eup %2795  ;;  %v1068_v62 = vmul.f32 %v2794_v48, %v1067_v55  ;;  %vm1085_vm9 = vweird.f32 %v3146_v53  ;;  %vm3181_vm10 = vcmp.eq.f32.partialorder %v1314_v59, 8.507059e+37  ;;  %v2601_v17 = vmul.f32 -1.442695, %v3164_v0 }
  0xa8   : > { %v2798_v1 = vpop.eup %2797  ;;  %v3168_v5 = vadd.f32 1.0, %v2796_v61  ;;  %vm3190_vm12 = vcmp.eq.f32.partialorder %v1089_v3, 8.507059e+37  ;;  %v1092_v24 = vor.u32 1.1754944e-38, %v1091_v4  ;;  %v1317_v30 = vor.u32 1.1754944e-38, %v1316_v9 }
  0xa9   : > { %v2800_v6 = vpop.eup %2799  ;;  %v1069_v7 = vadd.f32 %v2794_v48, %v1068_v62  ;;  %v1426_v8 = vmul.f32 %v2798_v1, %v3138_v43  ;;  %vm1431_vm11 = vweird.f32 %v2798_v1  ;;  %v3196_v31 = vadd.f32 %v3110_v18, %v864_v13  ;;  %v902_v62 = vpop.f32.mrf.mxu2 }
  0xaa   : > { %v1306_v11 = vmul.f32 %v2800_v6, %v3140_v46  ;;  %2807 = vrcp.f32 %v3168_v5  ;;  %v2802_v14 = vpop.eup %2801  ;;  %vm1311_vm13 = vweird.f32 %v2800_v6  ;;  %vm1445_vm14 = vweird.f32 %v3168_v5  ;;  %vm3202_vm15 = vmor %vm1430_vm5, %vm1431_vm11 }
  0xab   : > { %v1073_v15 = vsel %vm3175_vm8, %v2794_v48, %v1069_v7  ;;  %v1427_v16 = vsub.f32 1.0, %v1426_v8  ;;  %v2804_v19 = vpop.eup %2803  ;;  %v1081_v21 = vmul.f32 %v2802_v14, %v3146_v53  ;;  %vm1086_vm2 = vweird.f32 %v2802_v14  ;;  %vm3210_vm4 = vmor %vm1310_vm7, %vm1311_vm13 }
  0xac   : > { %v1307_v25 = vsub.f32 1.0, %v1306_v11  ;;  %v2806_v27 = vpop.eup %2805  ;;  %v1078_v32 = vsel %vm3150_vm3, %v1077_v57, %v1073_v15  ;;  %v3206_v38 = vadd.f32 1.0, %v2804_v19  ;;  %v1449_v42 = vand.u32 2147483647, %v3168_v5  ;;  %vm1087_vm5 = vmor %vm1085_vm9, %vm1086_vm2 }
  0xad   : > { %v1428_v29 = vmul.f32 %v2798_v1, %v1427_v16  ;;  %v1082_v35 = vsub.f32 1.0, %v1081_v21  ;;  %2809 = vpow2.f32 %v2601_v17  ;;  %v3216_v47 = vadd.f32 1.0, %v2806_v27  ;;  %v924_v17 = vpop.f32.mrf.mxu3 }
  0xae   : > { %v1308_v36 = vmul.f32 %v2800_v6, %v1307_v25  ;;  %2811 = vrcp.f32 %v3206_v38  ;;  %v3219_v48 = vmul.f32 %v1078_v32, %v3113_v20  ;;  %v1451_v50 = vand.u32 2147483648, %v3168_v5 }
  0xaf   : > { %v1429_v39 = vadd.f32 %v2798_v1, %v1428_v29  ;;  %v1083_v44 = vmul.f32 %v2802_v14, %v1082_v35  ;;  %v1104_v56 = vand.u32 2147483647, %v3206_v38  ;;  %v1106_v57 = vand.u32 2147483648, %v3206_v38 }
  0xb0   : > { %v2808_v43 = vpop.eup %2807  ;;  %v1309_v45 = vadd.f32 %v2800_v6, %v1308_v36  ;;  %2813 = vrcp.f32 %v3216_v47  ;;  %v1577_v4 = vpack.c.bf16 %v3219_v48, %v3219_v48  ;;  %vm3255_vm7 = vcmp.eq.f32.partialorder %v1449_v42, 8.507059e+37 }
  0xb1   : > { %v1433_v46 = vsel %vm3202_vm15, %v2798_v1, %v1429_v39  ;;  %v1441_v49 = vmul.f32 %v2808_v43, %v3168_v5  ;;  %v1084_v52 = vadd.f32 %v2802_v14, %v1083_v44  ;;  %vm1446_vm3 = vweird.f32 %v2808_v43 }
  0xb2   : > { %v1438_v51 = vsel %vm3159_vm6, %v1437_v2, %v1433_v46  ;;  %v1313_v54 = vsel %vm3210_vm4, %v2800_v6, %v1309_v45  ;;  %v2578_v2 = vmul.f32 -1.442695, %v3196_v31  ;;  %vm3251_vm6 = vmor %vm1445_vm14, %vm1446_vm3  ;;  %v1452_v6 = vor.u32 1.1754944e-38, %v1451_v50  ;;  %v904_v45 = vpop.f32.mrf.mxu2 }
  0xb3   : > { %v1318_v20 = vsel %vm3181_vm10, %v1317_v30, %v1313_v54  ;;  %v1442_v55 = vsub.f32 1.0, %v1441_v49  ;;  %v3237_v59 = vmul.f32 %v1438_v51, %v3117_v23  ;;  %v1088_v60 = vsel %vm1087_vm5, %v2802_v14, %v1084_v52  ;;  %v2810_v53 = vpop.eup %2809  ;;  %v867_v30 = vpop.f32.mrf.mxu1 }
  0xb4   : > { %v3240_v61 = vmul.f32 %v1318_v20, %v3120_v26  ;;  %v1093_v63 = vsel %vm3190_vm12, %v1092_v24, %v1088_v60  ;;  %v2812_v3 = vpop.eup %2811  ;;  %vm1730_vm8 = vcmp.lt.s32.totalorder %v3155_v58, 1  ;;  %vm1100_vm9 = vweird.f32 %v3206_v38 }
  0xb5   : > { %v1443_v1 = vmul.f32 %v2808_v43, %v1442_v55  ;;  %v1096_v8 = vmul.f32 %v2812_v3, %v3206_v38  ;;  %v1107_v9 = vor.u32 1.1754944e-38, %v1106_v57  ;;  %v1601_v5 = vpack.c.bf16 %v3237_v59, %v3237_v59 }
  0xb6   : > { %v1771_v10 = vrot.slane %v3237_v59, 7  ;;  %v3266_v11 = vmul.f32 %v1093_v63, %v3124_v28  ;;  %v1593_v12 = vpack.c.bf16 %v3240_v61, %v3240_v61  ;;  %vm3270_vm10 = vcmp.eq.f32.partialorder %v1104_v56, 8.507059e+37  ;;  %v2814_v19 = vpop.eup %2813 }
  0xb7   : > { %v1444_v7 = vadd.f32 %v2808_v43, %v1443_v1  ;;  %v1097_v15 = vsub.f32 1.0, %v1096_v8  ;;  %v3276_v16 = vadd.f32 1.0, %v2810_v53  ;;  %2815 = vpow2.f32 %v2578_v2 }
  0xb8   : > { %v1329_v21 = vand.u32 2147483647, %v3216_v47  ;;  %v3282_v22 = vadd.f32 %v3110_v18, %v902_v62  ;;  %v3285_v24 = vadd.f32 %v3110_v18, %v924_v17  ;;  %vm1101_vm11 = vweird.f32 %v2812_v3 }
  0xb9   : > { %v1448_v14 = vsel %vm3251_vm6, %v2808_v43, %v1444_v7  ;;  %v1098_v27 = vmul.f32 %v2812_v3, %v1097_v15  ;;  %v1321_v29 = vmul.f32 %v2814_v19, %v3216_v47  ;;  %v3291_v32 = vunpack.c.l.b16 %v1601_v5  ;;  %vm3301_vm14 = vmor %vm1100_vm9, %vm1101_vm11  ;;  %v927_v5 = vpop.f32.mrf.mxu3 }
  0xba   : > { %v1453_v28 = vsel %vm3255_vm7, %v1452_v6, %v1448_v14  ;;  %vm1325_vm12 = vweird.f32 %v3216_v47  ;;  %v1331_v33 = vand.u32 2147483648, %v3216_v47  ;;  %2817 = vrcp.f32 %v3276_v16 }
  0xbb   : > { %v3288_v25 = vmul.f32 %v1453_v28, %v3129_v34  ;;  %v1099_v36 = vadd.f32 %v2812_v3, %v1098_v27  ;;  %v1322_v39 = vsub.f32 1.0, %v1321_v29  ;;  %vm1326_vm13 = vweird.f32 %v2814_v19 }
  0xbc   : > { %v1578_v34 = vpack.c.bf16 %v3266_v11, %v3266_v11  ;;  %vm3305_vm15 = vcmp.eq.f32.partialorder %v1329_v21, 8.507059e+37  ;;  %v2593_v43 = vmul.f32 -1.442695, %v3282_v22  ;;  %v2602_v44 = vmul.f32 -1.442695, %v3285_v24  ;;  %vm3324_vm2 = vmor %vm1325_vm12, %vm1326_vm13  ;;  %v869_v11 = vpop.f32.mrf.mxu1 }
  0xbd   : > { %v1772_v35 = vrot.slane %v3288_v25, 7  ;;  %v2816_v46 = vpop.eup %2815  ;;  %v1103_v49 = vsel %vm3301_vm14, %v2812_v3, %v1099_v36  ;;  %v1323_v50 = vmul.f32 %v2814_v19, %v1322_v39  ;;  %v1464_v51 = vand.u32 2147483647, %v3276_v16 }
  0xbe   : > { %v1332_v54 = vor.u32 1.1754944e-38, %v1331_v33  ;;  %v3328_v20 = vadd.f32 1.0, %v2816_v46  ;;  %2819 = vpow2.f32 %v2593_v43  ;;  %v3331_v55 = vadd.f32 %v3110_v18, %v867_v30 }
  0xbf   : > { %v3317_v38 = vsel %vm1730_vm8, %v1771_v10, %v1772_v35  ;;  %v1108_v56 = vsel %vm3270_vm10, %v1107_v9, %v1103_v49  ;;  %v1324_v57 = vadd.f32 %v2814_v19, %v1323_v50  ;;  %2821 = vpow2.f32 %v2602_v44 }
  0xc0   : > { %v3336_v60 = vadd.f32 %v3110_v18, %v904_v45  ;;  %v2818_v47 = vpop.eup %2817  ;;  %v3338_v61 = vunpack.c.l.b16 %v1593_v12  ;;  %vm1460_vm4 = vweird.f32 %v3276_v16  ;;  %v1466_v62 = vand.u32 2147483648, %v3276_v16 }
  0xc1   : > { %2823 = vrcp.f32 %v3328_v20  ;;  %v1602_v53 = vpack.c.bf16 %v3288_v25, %v3288_v25  ;;  %v1328_v63 = vsel %vm3324_vm2, %v2814_v19, %v1324_v57  ;;  %v1456_v1 = vmul.f32 %v2818_v47, %v3276_v16 }
  0xc2   : > { %vm3348_vm3 = vcmp.eq.f32.partialorder %v1464_v51, 8.507059e+37  ;;  %v3353_v3 = vmul.f32 %v1108_v56, %v3136_v40  ;;  %v1333_v23 = vsel %vm3305_vm15, %v1332_v54, %v1328_v63  ;;  %v1119_v26 = vand.u32 2147483647, %v3328_v20 }
  0xc3   : > { %v2579_v6 = vmul.f32 -1.442695, %v3331_v55  ;;  %v1562_v7 = vmul.f32 %v1333_v23, %v3132_v37  ;;  %v1457_v8 = vsub.f32 1.0, %v1456_v1  ;;  %vm1461_vm5 = vweird.f32 %v2818_v47 }
  0xc4   : > { %v2594_v9 = vmul.f32 -1.442695, %v3336_v60  ;;  %v2820_v12 = vpop.eup %2819  ;;  %v3362_v40 = vadd.f32 %v3110_v18, %v927_v5  ;;  %v1831_v13 = vunpack.c.l.b16 %v1577_v4  ;;  %v1832_v14 = vunpack.c.l.b16 %v1578_v34  ;;  %vm3375_vm6 = vmor %vm1460_vm4, %vm1461_vm5 }
  0xc5   : > { %2825 = vpow2.f32 %v2579_v6  ;;  %v2822_v15 = vpop.eup %2821  ;;  %v1458_v17 = vmul.f32 %v2818_v47, %v1457_v8  ;;  %v1121_v37 = vand.u32 2147483648, %v3328_v20  ;;  %v3368_v19 = vadd.f32 1.0, %v2820_v12 }
  0xc6   : > { %2827 = vpow2.f32 %v2594_v9  ;;  %v1467_v27 = vor.u32 1.1754944e-38, %v1466_v62  ;;  %v3379_v48 = vadd.f32 1.0, %v2822_v15  ;;  %v3382_v4 = vadd.f32 %v3110_v18, %v869_v11  ;;  %v929_v11 = vpop.f32.mrf.mxu3 }
  0xc7   : > { %v3370_v28 = vpop.eup %2823  ;;  %v1839_v29 = vpack.c.b16 %v1832_v14, %v1831_v13  ;;  %v3384_v30 = vunpack.c.l.b16 %v1602_v53  ;;  %v1459_v33 = vadd.f32 %v2818_v47, %v1458_v17  ;;  %vm1115_vm7 = vweird.f32 %v3328_v20 }
  0xc8   : > { %v1111_v36 = vmul.f32 %v3370_v28, %v3328_v20  ;;  %v1579_v16 = vpack.c.bf16 %v3353_v3, %v3353_v3  ;;  %v1594_v39 = vpack.c.bf16 %v1562_v7, %v1562_v7  ;;  %2829 = vrcp.f32 %v3368_v19 }
  0xc9   : > { %v2603_v34 = vmul.f32 -1.442695, %v3362_v40  ;;  %1843 = vrot.lane.b32.xlu0 %v1839_v29, %s3002_s13  ;;  %v1463_v41 = vsel %vm3375_vm6, %v2818_v47, %v1459_v33  ;;  %vm3396_vm9 = vcmp.eq.f32.partialorder %v1119_v26, 8.507059e+37  ;;  %v1122_v44 = vor.u32 1.1754944e-38, %v1121_v37  ;;  %v872_v37 = vpop.f32.mrf.mxu1 }
  0xca   : > { %v1112_v42 = vsub.f32 1.0, %v1111_v36  ;;  %2831 = vrcp.f32 %v3379_v48  ;;  %v1468_v46 = vsel %vm3348_vm3, %v1467_v27, %v1463_v41  ;;  %v1344_v49 = vand.u32 2147483647, %v3368_v19 }
  0xcb   : > { %v2826_v45 = vpop.eup %2825  ;;  %v1346_v50 = vand.u32 2147483648, %v3368_v19  ;;  %v2580_v51 = vmul.f32 -1.442695, %v3382_v4  ;;  %v3407_v54 = vmul.f32 %v1468_v46, %v3164_v0  ;;  %vm1116_vm10 = vweird.f32 %v3370_v28 }
  0xcc   : > { %v2828_v52 = vpop.eup %2827  ;;  %v1113_v56 = vmul.f32 %v3370_v28, %v1112_v42  ;;  %v3411_v57 = vadd.f32 1.0, %v2826_v45  ;;  %v3413_v47 = vunpack.c.l.b16 %v1594_v39  ;;  %v1479_v62 = vand.u32 2147483647, %v3379_v48  ;;  %vm3423_vm13 = vmor %vm1115_vm7, %vm1116_vm10 }
  0xcd   : > { %v1481_v53 = vand.u32 2147483648, %v3379_v48  ;;  %2833 = vpow2.f32 %v2603_v34  ;;  %v1773_v63 = vrot.slane %v3407_v54, 7  ;;  %vm1340_vm11 = vweird.f32 %v3368_v19 }
  0xce   : > { %v1114_v1 = vadd.f32 %v3370_v28, %v1113_v56  ;;  %vm1475_vm12 = vweird.f32 %v3379_v48  ;;  %v2830_v0 = vpop.eup %2829  ;;  %vm3427_vm14 = vcmp.eq.f32.partialorder %v1344_v49, 8.507059e+37  ;;  %v1347_v26 = vor.u32 1.1754944e-38, %v1346_v50 }
  0xcf   : > { %2835 = vrcp.f32 %v3411_v57  ;;  %v3432_v6 = vadd.f32 1.0, %v2828_v52  ;;  %v1603_v8 = vpack.c.bf16 %v3407_v54, %v3407_v54  ;;  %v3442_v20 = vsel %vm1730_vm8, %v1772_v35, %v1773_v63 }
  0xd0   : > { %v2832_v7 = vpop.eup %2831  ;;  %v1118_v9 = vsel %vm3423_vm13, %v3370_v28, %v1114_v1  ;;  %v1336_v5 = vmul.f32 %v2830_v0, %v3368_v19  ;;  %vm3449_vm15 = vcmp.eq.f32.partialorder %v1479_v62, 8.507059e+37  ;;  %v1482_v14 = vor.u32 1.1754944e-38, %v1481_v53 }
  0xd1   : > { %v1471_v12 = vmul.f32 %v2832_v7, %v3379_v48  ;;  %v3454_v25 = vadd.f32 %v3110_v18, %v929_v11  ;;  %vm1341_vm2 = vweird.f32 %v2830_v0  ;;  %v1134_v35 = vand.u32 2147483647, %v3411_v57  ;;  %v874_v13 = vpop.f32.mrf.mxu1 }
  0xd2   : > { %v1337_v15 = vsub.f32 1.0, %v1336_v5  ;;  %v1136_v17 = vand.u32 2147483648, %v3411_v57  ;;  %v1123_v21 = vsel %vm3396_vm9, %v1122_v44, %v1118_v9  ;;  %vm1476_vm4 = vweird.f32 %v2832_v7  ;;  %vm3468_vm5 = vmor %vm1340_vm11, %vm1341_vm2 }
  0xd3   : > { %v2834_v28 = vpop.eup %2833  ;;  %v1472_v27 = vsub.f32 1.0, %v1471_v12  ;;  %2837 = vrcp.f32 %v3432_v6  ;;  %v3461_v29 = vunpack.c.l.b16 %v1603_v8  ;;  %vm1130_vm3 = vweird.f32 %v3411_v57  ;;  %vm3479_vm6 = vmor %vm1475_vm12, %vm1476_vm4 }
  0xd4   : > { %v1338_v33 = vmul.f32 %v2830_v0, %v1337_v15  ;;  %v3464_v36 = vadd.f32 1.0, %v2834_v28  ;;  %v1359_v42 = vand.u32 2147483647, %v3432_v6  ;;  %2839 = vpow2.f32 %v2580_v51 }
  0xd5   : > { %v2836_v39 = vpop.eup %2835  ;;  %v1473_v41 = vmul.f32 %v2832_v7, %v1472_v27  ;;  %v2604_v43 = vmul.f32 -1.442695, %v3454_v25  ;;  %v3475_v44 = vmul.f32 %v1123_v21, %v3196_v31  ;;  %vm3484_vm7 = vcmp.eq.f32.partialorder %v1134_v35, 8.507059e+37 }
  0xd6   : > { %v1339_v45 = vadd.f32 %v2830_v0, %v1338_v33  ;;  %v1126_v19 = vmul.f32 %v2836_v39, %v3411_v57  ;;  %v1137_v51 = vor.u32 1.1754944e-38, %v1136_v17  ;;  %v1361_v52 = vand.u32 2147483648, %v3432_v6 }
  0xd7   : > { %v1474_v50 = vadd.f32 %v2832_v7, %v1473_v41  ;;  %2841 = vrcp.f32 %v3464_v36  ;;  %vm1355_vm9 = vweird.f32 %v3432_v6  ;;  %vm3497_vm10 = vcmp.eq.f32.partialorder %v1359_v42, 8.507059e+37 }
  0xd8   : > { %v1343_v31 = vsel %vm3468_vm5, %v2830_v0, %v1339_v45  ;;  %v1127_v48 = vsub.f32 1.0, %v1126_v19  ;;  %2843 = vpow2.f32 %v2604_v43  ;;  %v3502_v2 = vadd.f32 %v3110_v18, %v872_v37 }
  0xd9   : > { %v2838_v56 = vpop.eup %2837  ;;  %v1348_v62 = vsel %vm3427_vm14, %v1347_v26, %v1343_v31  ;;  %v1478_v53 = vsel %vm3479_vm6, %v2832_v7, %v1474_v50  ;;  %vm1131_vm11 = vweird.f32 %v2836_v39  ;;  %v1362_v7 = vor.u32 1.1754944e-38, %v1361_v52 }
  0xda   : > { %v1483_v0 = vsel %vm3449_vm15, %v1482_v14, %v1478_v53  ;;  %v1128_v8 = vmul.f32 %v2836_v39, %v1127_v48  ;;  %v1351_v9 = vmul.f32 %v2838_v56, %v3432_v6  ;;  %v2840_v5 = vpop.eup %2839  ;;  %v1563_v23 = vmul.f32 %v1348_v62, %v3282_v22  ;;  %vm1132_vm13 = vmor %vm1130_vm3, %vm1131_vm11 }
  0xdb   : > { %v3509_v26 = vmul.f32 %v1483_v0, %v3285_v24  ;;  %v2581_v11 = vmul.f32 -1.442695, %v3502_v2  ;;  %vm1356_vm12 = vweird.f32 %v2838_v56  ;;  %v3512_v35 = vadd.f32 1.0, %v2840_v5  ;;  %v932_v24 = vpop.f32.mrf.mxu3 }
  0xdc   : > { %v1129_v12 = vadd.f32 %v2836_v39, %v1128_v8  ;;  %v1352_v15 = vsub.f32 1.0, %v1351_v9  ;;  %vm1490_vm14 = vweird.f32 %v3464_v36  ;;  %v1494_v22 = vand.u32 2147483647, %v3464_v36  ;;  %vm3536_vm15 = vmor %vm1355_vm9, %vm1356_vm12 }
  0xdd   : > { %v2842_v14 = vpop.eup %2841  ;;  %v1774_v17 = vrot.slane %v3509_v26, 7  ;;  %2845 = vpow2.f32 %v2581_v11  ;;  %v3521_v33 = vadd.f32 %v3110_v18, %v932_v24  ;;  %v1595_v34 = vpack.c.bf16 %v1563_v23, %v1563_v23  ;;  %v877_v11 = vpop.f32.mrf.mxu1 }
  0xde   : > { %v2844_v37 = vpop.eup %2843  ;;  %v1133_v28 = vsel %vm1132_vm13, %v2836_v39, %v1129_v12  ;;  %v1353_v21 = vmul.f32 %v2838_v56, %v1352_v15  ;;  %v1486_v27 = vmul.f32 %v2842_v14, %v3464_v36  ;;  %v1496_v42 = vand.u32 2147483648, %v3464_v36 }
  0xdf   : > { %v3529_v57 = vsel %vm1730_vm8, %v1773_v63, %v1774_v17  ;;  %v1138_v41 = vsel %vm3484_vm7, %v1137_v51, %v1133_v28  ;;  %vm1491_vm2 = vweird.f32 %v2842_v14  ;;  %2847 = vrcp.f32 %v3512_v35 }
  0xe0   : > { %v1354_v43 = vadd.f32 %v2838_v56, %v1353_v21  ;;  %v1487_v45 = vsub.f32 1.0, %v1486_v27  ;;  %v1580_v54 = vpack.c.bf16 %v3475_v44, %v3475_v44  ;;  %v1604_v63 = vpack.c.bf16 %v3509_v26, %v3509_v26  ;;  %vm3562_vm3 = vmor %vm1490_vm14, %vm1491_vm2 }
  0xe1   : > { %v1549_v46 = vmul.f32 %v1138_v41, %v3331_v55  ;;  %v3547_v6 = vadd.f32 1.0, %v2844_v37  ;;  %vm3551_vm4 = vcmp.eq.f32.partialorder %v1494_v22, 8.507059e+37  ;;  %v2605_v51 = vmul.f32 -1.442695, %v3521_v33  ;;  %v907_v55 = vpop.f32.mrf.mxu2 }
  0xe2   : > { %v1358_v19 = vsel %vm3536_vm15, %v2838_v56, %v1354_v43  ;;  %v1488_v49 = vmul.f32 %v2842_v14, %v1487_v45  ;;  %v3556_v31 = vunpack.c.l.b16 %v1595_v34  ;;  %v1497_v56 = vor.u32 1.1754944e-38, %v1496_v42 }
  0xe3   : > { %v2846_v52 = vpop.eup %2845  ;;  %v1363_v48 = vsel %vm3497_vm10, %v1362_v7, %v1358_v19  ;;  %2849 = vrcp.f32 %v3547_v6  ;;  %v1149_v0 = vand.u32 2147483647, %v3512_v35  ;;  %v1151_v8 = vand.u32 2147483648, %v3512_v35  ;;  %v934_v41 = vpop.f32.mrf.mxu3 }
  0xe4   : > { %v1564_v62 = vmul.f32 %v1363_v48, %v3336_v60  ;;  %v1489_v53 = vadd.f32 %v2842_v14, %v1488_v49  ;;  %v3570_v9 = vunpack.c.l.b16 %v1604_v63  ;;  %v1581_v1 = vpack.c.bf16 %v1549_v46, %v1549_v46 }
  0xe5   : > { %v3572_v5 = vadd.f32 1.0, %v2846_v52  ;;  %2851 = vpow2.f32 %v2605_v51  ;;  %v2848_v36 = vpop.eup %2847  ;;  %vm1145_vm5 = vweird.f32 %v3512_v35  ;;  %v1509_v7 = vand.u32 2147483647, %v3547_v6 }
  0xe6   : > { %v1493_v23 = vsel %vm3562_vm3, %v2842_v14, %v1489_v53  ;;  %v1936_v60 = vpack.c.b16 %v3413_v47, %v3338_v61  ;;  %v1596_v12 = vpack.c.bf16 %v1564_v62, %v1564_v62  ;;  %v1141_v22 = vmul.f32 %v2848_v36, %v3512_v35 }
  0xe7   : > { %v1498_v15 = vsel %vm3551_vm4, %v1497_v56, %v1493_v23  ;;  %v3584_v24 = vadd.f32 %v3110_v18, %v874_v13  ;;  %vm3589_vm6 = vcmp.eq.f32.partialorder %v1149_v0, 8.507059e+37  ;;  %v1152_v28 = vor.u32 1.1754944e-38, %v1151_v8 }
  0xe8   : > { %v3587_v37 = vmul.f32 %v1498_v15, %v3362_v40  ;;  %2853 = vrcp.f32 %v3572_v5  ;;  %1940 = vrot.lane.b32.xlu0 %v1936_v60, %s3002_s13  ;;  %v3595_v47 = vunpack.c.l.b16 %v1581_v1  ;;  %v1142_v21 = vsub.f32 1.0, %v1141_v22 }
  0xe9   : > { %v2850_v61 = vpop.eup %2849  ;;  %vm1505_vm7 = vweird.f32 %v3547_v6  ;;  %v1511_v13 = vand.u32 2147483648, %v3547_v6  ;;  %vm1146_vm9 = vweird.f32 %v2848_v36  ;;  %vm3601_vm10 = vcmp.eq.f32.partialorder %v1509_v7, 8.507059e+37 }
  0xea   : > { %v1775_v40 = vrot.slane %v3587_v37, 7  ;;  %v1501_v27 = vmul.f32 %v2850_v61, %v3547_v6  ;;  %v3605_v42 = vunpack.c.l.b16 %v1596_v12  ;;  %v1143_v43 = vmul.f32 %v2848_v36, %v1142_v21  ;;  %vm1147_vm12 = vmor %vm1145_vm5, %vm1146_vm9 }
  0xeb   : > { %v2852_v39 = vpop.eup %2851  ;;  %v1164_v45 = vand.u32 2147483647, %v3572_v5  ;;  %v2582_v63 = vmul.f32 -1.442695, %v3584_v24  ;;  %vm1506_vm11 = vweird.f32 %v2850_v61  ;;  %v1512_v51 = vor.u32 1.1754944e-38, %v1511_v13 }
  0xec   : > { %v3615_v46 = vsel %vm1730_vm8, %v1774_v17, %v1775_v40  ;;  %v1502_v19 = vsub.f32 1.0, %v1501_v27  ;;  %v3617_v49 = vadd.f32 1.0, %v2852_v39  ;;  %v1144_v50 = vadd.f32 %v2848_v36, %v1143_v43  ;;  %vm3633_vm14 = vmor %vm1505_vm7, %vm1506_vm11 }
  0xed   : > { %2855 = vpow2.f32 %v2582_v63  ;;  %v3620_v52 = vadd.f32 %v3110_v18, %v934_v41  ;;  %vm1160_vm13 = vweird.f32 %v3572_v5  ;;  %v1166_v17 = vand.u32 2147483648, %v3572_v5 }
  0xee   : > { %v2854_v48 = vpop.eup %2853  ;;  %v1503_v26 = vmul.f32 %v2850_v61, %v1502_v19  ;;  %2857 = vrcp.f32 %v3617_v49  ;;  %v1605_v56 = vpack.c.bf16 %v3587_v37, %v3587_v37  ;;  %v1148_v62 = vsel %vm1147_vm12, %v2848_v36, %v1144_v50  ;;  %v879_v36 = vpop.f32.mrf.mxu1 }
  0xef   : > { %v1156_v35 = vmul.f32 %v2854_v48, %v3572_v5  ;;  %vm3638_vm15 = vcmp.eq.f32.partialorder %v1164_v45, 8.507059e+37  ;;  %v1153_v8 = vsel %vm3589_vm6, %v1152_v28, %v1148_v62  ;;  %v2606_v23 = vmul.f32 -1.442695, %v3620_v52 }
  0xf0   : > { %v1504_v1 = vadd.f32 %v2850_v61, %v1503_v26  ;;  %v1833_v6 = vunpack.c.l.b16 %v1579_v16  ;;  %vm1161_vm2 = vweird.f32 %v2854_v48  ;;  %v1526_v60 = vand.u32 2147483648, %v3617_v49 }
  0xf1   : > { %v1157_v7 = vsub.f32 1.0, %v1156_v35  ;;  %v1834_v12 = vunpack.c.l.b16 %v1580_v54  ;;  %2859 = vpow2.f32 %v2606_v23  ;;  %v3655_v22 = vadd.f32 %v3110_v18, %v877_v11  ;;  %vm1162_vm3 = vmor %vm1160_vm13, %vm1161_vm2 }
  0xf2   : > { %v1508_v15 = vsel %vm3633_vm14, %v2850_v61, %v1504_v1  ;;  %v3658_v14 = vadd.f32 %v3110_v18, %v907_v55  ;;  %v1550_v16 = vmul.f32 %v1153_v8, %v3382_v4  ;;  %v1167_v61 = vor.u32 1.1754944e-38, %v1166_v17  ;;  %v909_v17 = vpop.f32.mrf.mxu2 }
  0xf3   : > { %v2856_v3 = vpop.eup %2855  ;;  %v1513_v28 = vsel %vm3601_vm10, %v1512_v51, %v1508_v15  ;;  %v1158_v21 = vmul.f32 %v2854_v48, %v1157_v7  ;;  %v1840_v13 = vpack.c.b16 %v1834_v12, %v1833_v6  ;;  %v2583_v11 = vmul.f32 -1.442695, %v3655_v22 }
  0xf4   : > { %v2858_v44 = vpop.eup %2857  ;;  %v3664_v54 = vmul.f32 %v1513_v28, %v3454_v25  ;;  %v3666_v27 = vadd.f32 1.0, %v2856_v3  ;;  %vm1520_vm4 = vweird.f32 %v3617_v49  ;;  %v1524_v4 = vand.u32 2147483647, %v3617_v49 }
  0xf5   : > { %v1159_v41 = vadd.f32 %v2854_v48, %v1158_v21  ;;  %v1516_v39 = vmul.f32 %v2858_v44, %v3617_v49  ;;  %1845 = vrot.lane.b32.xlu2 %v1840_v13, %s3002_s13  ;;  %v1527_v25 = vor.u32 1.1754944e-38, %v1526_v60  ;;  %v2595_v43 = vmul.f32 -1.442695, %v3658_v14 }
  0xf6   : > { %v1776_v34 = vrot.slane %v3664_v54, 7  ;;  %2861 = vrcp.f32 %v3666_v27  ;;  %v1582_v45 = vpack.c.bf16 %v1550_v16, %v1550_v16  ;;  %vm1521_vm5 = vweird.f32 %v2858_v44 }
  0xf7   : > { %v1163_v63 = vsel %vm1162_vm3, %v2854_v48, %v1159_v41  ;;  %v1517_v19 = vsub.f32 1.0, %v1516_v39  ;;  %v2860_v50 = vpop.eup %2859  ;;  %v1606_v51 = vpack.c.bf16 %v3664_v54, %v3664_v54  ;;  %2863 = vpow2.f32 %v2583_v11  ;;  %vm3696_vm6 = vmor %vm1520_vm4, %vm1521_vm5  ;;  %v3766_v54 = vld [vmem:[%s4538_s5] ss:$0 sm:$0xff] }
  0xf8   : > { %v3687_v5 = vsel %vm1730_vm8, %v1775_v40, %v1776_v34  ;;  %v1168_v26 = vsel %vm3638_vm15, %v1167_v61, %v1163_v63  ;;  %v1179_v62 = vand.u32 2147483647, %v3666_v27  ;;  %v1181_v53 = vand.u32 2147483648, %v3666_v27 }
  0xf9   : > { %v1551_v48 = vmul.f32 %v1168_v26, %v3502_v2  ;;  %v1518_v55 = vmul.f32 %v2858_v44, %v1517_v19  ;;  %v3700_v40 = vadd.f32 1.0, %v2860_v50  ;;  %2865 = vpow2.f32 %v2595_v43  ;;  %v882_v2 = vpop.f32.mrf.mxu1 }
  0xfa   : > { %v1937_v35 = vpack.c.b16 %v3605_v42, %v3556_v31  ;;  %v3705_v0 = vadd.f32 %v3110_v18, %v879_v36  ;;  %v3707_v8 = vunpack.c.l.b16 %v1605_v56  ;;  %v1836_v1 = vunpack.c.l.b16 %v1582_v45  ;;  %v912_v19 = vpop.f32.mrf.mxu2 }
  0xfb   : > { %v1519_v23 = vadd.f32 %v2858_v44, %v1518_v55  ;;  %vm1525_vm7 = vcmp.eq.f32.partialorder %v1524_v4, 8.507059e+37  ;;  %v3709_v6 = vunpack.c.l.b16 %v1606_v51  ;;  %v1583_v7 = vpack.c.bf16 %v1551_v48, %v1551_v48 }
  0xfc   : > { %v2862_v49 = vpop.eup %2861  ;;  %vm1175_vm9 = vweird.f32 %v3666_v27  ;;  %2867 = vrcp.f32 %v3700_v40  ;;  %vm3716_vm10 = vcmp.eq.f32.partialorder %v1179_v62, 8.507059e+37  ;;  %v1182_v56 = vor.u32 1.1754944e-38, %v1181_v53 }
  0xfd   : > { %v1523_v31 = vsel %vm3696_vm6, %v2858_v44, %v1519_v23  ;;  %v1171_v42 = vmul.f32 %v2862_v49, %v3666_v27  ;;  %1942 = vrot.lane.b32.xlu2 %v1937_v35, %s3002_s13  ;;  %v2864_v60 = vpop.eup %2863  ;;  %v1539_v15 = vand.u32 2147483647, %v3700_v40  ;;  %v2584_v3 = vmul.f32 -1.442695, %v3705_v0 }
  0xfe   : > { %v1528_v12 = vsel %vm1525_vm7, %v1527_v25, %v1523_v31  ;;  %v3724_v16 = vadd.f32 %v3110_v18, %v909_v17  ;;  %v1541_v13 = vand.u32 2147483648, %v3700_v40  ;;  %v3730_v44 = vadd.f32 1.0, %v2864_v60 }
  0xff   : > { %v3727_v28 = vmul.f32 %v1528_v12, %v3521_v33  ;;  %v1172_v21 = vsub.f32 1.0, %v1171_v42  ;;  %v2866_v61 = vpop.eup %2865  ;;  %v3732_v11 = vunpack.c.l.b16 %v1583_v7  ;;  %vm1535_vm11 = vweird.f32 %v3700_v40 }
 0x100   : > { %2869 = vpow2.f32 %v2584_v3  ;;  %v1841_v41 = vpack.c.b16 %v1836_v1, %v3595_v47  ;;  %vm1176_vm12 = vweird.f32 %v2862_v49  ;;  %vm3738_vm13 = vcmp.eq.f32.partialorder %v1539_v15, 8.507059e+37 }
 0x101   : > { %v1777_v39 = vrot.slane %v3727_v28, 7  ;;  %v1173_v4 = vmul.f32 %v2862_v49, %v1172_v21  ;;  %2871 = vrcp.f32 %v3730_v44  ;;  %v3742_v43 = vadd.f32 1.0, %v2866_v61  ;;  %vm1177_vm14 = vmor %vm1175_vm9, %vm1176_vm12  ;;  %v884_v48 = vpop.f32.mrf.mxu1 }
 0x102   : > { %v2868_v33 = vpop.eup %2867  ;;  %v2596_v45 = vmul.f32 -1.442695, %v3724_v16  ;;  %v3746_v63 = vadd.f32 %v3110_v18, %v882_v2  ;;  %v1542_v26 = vor.u32 1.1754944e-38, %v1541_v13  ;;  %v1607_v17 = vpack.c.bf16 %v3727_v28, %v3727_v28 }
 0x103   : > { %v3754_v47 = vsel %vm1730_vm8, %v1776_v34, %v1777_v39  ;;  %v1174_v50 = vadd.f32 %v2862_v49, %v1173_v4  ;;  %v1531_v51 = vmul.f32 %v2868_v33, %v3700_v40  ;;  %v1194_v18 = vand.u32 2147483647, %v3730_v44 }
 0x104   : > { %2873 = vrcp.f32 %v3742_v43  ;;  %v3769_v34 = vadd.f32 %v3766_v54, %v912_v19  ;;  %vm1536_vm15 = vweird.f32 %v2868_v33  ;;  %v1196_v53 = vand.u32 2147483648, %v3730_v44 }
 0x105   : > { %v1178_v55 = vsel %vm1177_vm14, %v2862_v49, %v1174_v50  ;;  %v1532_v62 = vsub.f32 1.0, %v1531_v51  ;;  %1847 = vrot.lane.b32.xlu2 %v1841_v41, %s3002_s13  ;;  %v1374_v35 = vand.u32 2147483647, %v3742_v43  ;;  %2875 = vpow2.f32 %v2596_v45  ;;  %vm3789_vm2 = vmor %vm1535_vm11, %vm1536_vm15 }
 0x106   : > { %v2870_v27 = vpop.eup %2869  ;;  %v1183_v37 = vsel %vm3716_vm10, %v1182_v56, %v1178_v55  ;;  %v2585_v2 = vmul.f32 -1.442695, %v3746_v63  ;;  %v1376_v7 = vand.u32 2147483648, %v3742_v43  ;;  %v3781_v31 = vadd.f32 %v3766_v54, %v884_v48 }
 0x107   : > { %v2872_v1 = vpop.eup %2871  ;;  %v1533_v23 = vmul.f32 %v2868_v33, %v1532_v62  ;;  %v3778_v49 = vadd.f32 1.0, %v2870_v27  ;;  %v3783_v42 = vunpack.c.l.b16 %v1607_v17  ;;  %v1552_v60 = vmul.f32 %v1183_v37, %v3584_v24 }
 0x108   : > { %v1186_v56 = vmul.f32 %v2872_v1, %v3730_v44  ;;  %vm1190_vm4 = vweird.f32 %v3730_v44  ;;  %vm3795_vm3 = vcmp.eq.f32.partialorder %v1194_v18, 8.507059e+37  ;;  %v1197_v3 = vor.u32 1.1754944e-38, %v1196_v53  ;;  %v914_v18 = vpop.f32.mrf.mxu2 }
 0x109   : > { %v1534_v12 = vadd.f32 %v2868_v33, %v1533_v23  ;;  %vm1370_vm5 = vweird.f32 %v3742_v43  ;;  %2877 = vrcp.f32 %v3778_v49  ;;  %vm3801_vm6 = vcmp.eq.f32.partialorder %v1374_v35, 8.507059e+37  ;;  %v887_v44 = vpop.f32.mrf.mxu1 }
 0x10a   : > { %v2874_v24 = vpop.eup %2873  ;;  %v1187_v40 = vsub.f32 1.0, %v1186_v56  ;;  %2879 = vpow2.f32 %v2585_v2  ;;  %v2597_v13 = vmul.f32 -1.442695, %v3769_v34  ;;  %vm1191_vm7 = vweird.f32 %v2872_v1 }
 0x10b   : > { %v1538_v61 = vsel %vm3789_vm2, %v2868_v33, %v1534_v12  ;;  %v1366_v41 = vmul.f32 %v2874_v24, %v3742_v43  ;;  %v1377_v4 = vor.u32 1.1754944e-38, %v1376_v7  ;;  %v2876_v45 = vpop.eup %2875  ;;  %v1584_v19 = vpack.c.bf16 %v1552_v60, %v1552_v60  ;;  %vm3820_vm10 = vmor %vm1190_vm4, %vm1191_vm7 }
 0x10c   : > { %v1543_v50 = vsel %vm3738_vm13, %v1542_v26, %v1538_v61  ;;  %v1188_v51 = vmul.f32 %v2872_v1, %v1187_v40  ;;  %v1209_v17 = vand.u32 2147483647, %v3778_v49  ;;  %v1211_v62 = vand.u32 2147483648, %v3778_v49 }
 0x10d   : > { %v1576_v48 = vmul.f32 %v1543_v50, %v3620_v52  ;;  %v1367_v55 = vsub.f32 1.0, %v1366_v41  ;;  %v3814_v53 = vadd.f32 1.0, %v2876_v45  ;;  %vm1371_vm9 = vweird.f32 %v2874_v24 }
 0x10e   : > { %v1189_v33 = vadd.f32 %v2872_v1, %v1188_v51  ;;  %2881 = vpow2.f32 %v2597_v13  ;;  %v2586_v27 = vmul.f32 -1.442695, %v3781_v31  ;;  %v3826_v26 = vadd.f32 %v3766_v54, %v914_v18  ;;  %vm3849_vm12 = vmor %vm1370_vm5, %vm1371_vm9 }
 0x10f   : > { %v2878_v37 = vpop.eup %2877  ;;  %v1778_v35 = vrot.slane %v1576_v48, 7  ;;  %v1368_v52 = vmul.f32 %v2874_v24, %v1367_v55  ;;  %2883 = vrcp.f32 %v3814_v53  ;;  %v3828_v23 = vunpack.c.l.b16 %v1584_v19 }
 0x110   : > { %v2880_v2 = vpop.eup %2879  ;;  %v1193_v7 = vsel %vm3820_vm10, %v2872_v1, %v1189_v33  ;;  %v1201_v60 = vmul.f32 %v2878_v37, %v3778_v49  ;;  %vm1205_vm11 = vweird.f32 %v3778_v49  ;;  %v1608_v36 = vpack.c.bf16 %v1576_v48, %v1576_v48 }
 0x111   : > { %v3838_v56 = vsel %vm1730_vm8, %v1777_v39, %v1778_v35  ;;  %v3844_v12 = vsel %vm1730_vm8, %v1778_v35, %v1771_v10  ;;  %vm3853_vm13 = vcmp.eq.f32.partialorder %v1209_v17, 8.507059e+37  ;;  %v1198_v28 = vsel %vm3795_vm3, %v1197_v3, %v1193_v7 }
 0x112   : > { %v1369_v39 = vadd.f32 %v2874_v24, %v1368_v52  ;;  %v1202_v59 = vsub.f32 1.0, %v1201_v60  ;;  %v1212_v13 = vor.u32 1.1754944e-38, %v1211_v62  ;;  %v3859_v61 = vadd.f32 1.0, %v2880_v2 }
 0x113   : > { %2885 = vpow2.f32 %v2586_v27  ;;  %v2598_v10 = vmul.f32 -1.442695, %v3826_v26  ;;  %v3863_v43 = vadd.f32 %v3766_v54, %v887_v44  ;;  %vm1206_vm14 = vweird.f32 %v2878_v37 }
 0x114   : > { %v2882_v41 = vpop.eup %2881  ;;  %v1373_v45 = vsel %vm3849_vm12, %v2874_v24, %v1369_v39  ;;  %v1203_v19 = vmul.f32 %v2878_v37, %v1202_v59  ;;  %vm1385_vm15 = vweird.f32 %v3814_v53  ;;  %v3868_v3 = vunpack.c.l.b16 %v1608_v36  ;;  %vm1207_vm2 = vmor %vm1205_vm11, %vm1206_vm14 }
 0x115   : > { %v2884_v15 = vpop.eup %2883  ;;  %v3871_v50 = vmul.f32 %v1198_v28, %v3655_v22  ;;  %v1378_v51 = vsel %vm3801_vm6, %v1377_v4, %v1373_v45  ;;  %2887 = vrcp.f32 %v3859_v61  ;;  %v1389_v48 = vand.u32 2147483647, %v3814_v53 }
 0x116   : > { %v1565_v17 = vmul.f32 %v1378_v51, %v3658_v14  ;;  %v1204_v18 = vadd.f32 %v2878_v37, %v1203_v19  ;;  %v1381_v24 = vmul.f32 %v2884_v15, %v3814_v53  ;;  %vm1386_vm4 = vweird.f32 %v2884_v15 }
 0x117   : > { %v1391_v55 = vand.u32 2147483648, %v3814_v53  ;;  %v3882_v22 = vadd.f32 1.0, %v2882_v41  ;;  %2889 = vpow2.f32 %v2598_v10  ;;  %v1224_v62 = vand.u32 2147483647, %v3859_v61  ;;  %vm3901_vm5 = vmor %vm1385_vm15, %vm1386_vm4  ;;  %v889_v53 = vpop.f32.mrf.mxu1 }
 0x118   : > { %v1208_v21 = vsel %vm1207_vm2, %v2878_v37, %v1204_v18  ;;  %v1382_v4 = vsub.f32 1.0, %v1381_v24  ;;  %v2587_v14 = vmul.f32 -1.442695, %v3863_v43  ;;  %v1597_v27 = vpack.c.bf16 %v1565_v17, %v1565_v17 }
 0x119   : > { %v2886_v33 = vpop.eup %2885  ;;  %v1213_v35 = vsel %vm3853_vm13, %v1212_v13, %v1208_v21  ;;  %v1226_v49 = vand.u32 2147483648, %v3859_v61  ;;  %2891 = vrcp.f32 %v3882_v22  ;;  %v1722_v25 = vrot.slane %v3871_v50, 7 }
 0x11a   : > { %v3892_v52 = vmul.f32 %v1213_v35, %v3705_v0  ;;  %v1383_v37 = vmul.f32 %v2884_v15, %v1382_v4  ;;  %vm3894_vm3 = vcmp.eq.f32.partialorder %v1389_v48, 8.507059e+37  ;;  %v1392_v44 = vor.u32 1.1754944e-38, %v1391_v55 }
 0x11b   : > { %v2888_v7 = vpop.eup %2887  ;;  %vm1220_vm6 = vweird.f32 %v3859_v61  ;;  %v3906_v36 = vadd.f32 1.0, %v2886_v33  ;;  %2893 = vpow2.f32 %v2587_v14  ;;  %vm3910_vm7 = vcmp.eq.f32.partialorder %v1224_v62, 8.507059e+37 }
 0x11c   : > { %v1723_v0 = vrot.slane %v3892_v52, 7  ;;  %v1384_v1 = vadd.f32 %v2884_v15, %v1383_v37  ;;  %v1216_v40 = vmul.f32 %v2888_v7, %v3859_v61  ;;  %v3914_v59 = vunpack.c.l.b16 %v1597_v27 }
 0x11d   : > { %v2890_v39 = vpop.eup %2889  ;;  %v1227_v13 = vor.u32 1.1754944e-38, %v1226_v49  ;;  %v1404_v10 = vand.u32 2147483647, %v3882_v22  ;;  %2895 = vrcp.f32 %v3906_v36  ;;  %v1406_v51 = vand.u32 2147483648, %v3882_v22 }
 0x11e   : > { %v3924_v41 = vsel %vm1730_vm8, %v1722_v25, %v1723_v0  ;;  %v1388_v45 = vsel %vm3901_vm5, %v2884_v15, %v1384_v1  ;;  %v1217_v19 = vsub.f32 1.0, %v1216_v40  ;;  %vm1221_vm9 = vweird.f32 %v2888_v7 }
 0x11f   : > { %v2892_v17 = vpop.eup %2891  ;;  %v1393_v18 = vsel %vm3894_vm3, %v1392_v44, %v1388_v45  ;;  %v3931_v24 = vadd.f32 1.0, %v2890_v39  ;;  %v3934_v48 = vadd.f32 %v3766_v54, %v889_v53  ;;  %v1239_v15 = vand.u32 2147483647, %v3906_v36  ;;  %vm1222_vm13 = vmor %vm1220_vm6, %vm1221_vm9 }
 0x120   : > { %v1566_v55 = vmul.f32 %v1393_v18, %v3724_v16  ;;  %v1218_v21 = vmul.f32 %v2888_v7, %v1217_v19  ;;  %v1396_v4 = vmul.f32 %v2892_v17, %v3882_v22  ;;  %vm1400_vm10 = vweird.f32 %v3882_v22 }
 0x121   : > { %v2894_v62 = vpop.eup %2893  ;;  %vm3940_vm11 = vcmp.eq.f32.partialorder %v1404_v10, 8.507059e+37  ;;  %v1241_v33 = vand.u32 2147483648, %v3906_v36  ;;  %2897 = vrcp.f32 %v3931_v24  ;;  %vm1401_vm12 = vweird.f32 %v2892_v17 }
 0x122   : > { %v1219_v27 = vadd.f32 %v2888_v7, %v1218_v21  ;;  %v1397_v35 = vsub.f32 1.0, %v1396_v4  ;;  %v1407_v16 = vor.u32 1.1754944e-38, %v1406_v51  ;;  %v1598_v37 = vpack.c.bf16 %v1566_v55, %v1566_v55  ;;  %vm3963_vm2 = vmor %vm1400_vm10, %vm1401_vm12 }
 0x123   : > { %v2896_v49 = vpop.eup %2895  ;;  %vm1235_vm14 = vweird.f32 %v3906_v36  ;;  %v3950_v2 = vadd.f32 1.0, %v2894_v62  ;;  %v2588_v60 = vmul.f32 -1.442695, %v3934_v48  ;;  %vm3954_vm15 = vcmp.eq.f32.partialorder %v1239_v15, 8.507059e+37 }
 0x124   : > { %v1223_v44 = vsel %vm1222_vm13, %v2888_v7, %v1219_v27  ;;  %v1398_v1 = vmul.f32 %v2892_v17, %v1397_v35  ;;  %v1231_v40 = vmul.f32 %v2896_v49, %v3906_v36  ;;  %v1419_v39 = vand.u32 2147483647, %v3931_v24 }
 0x125   : > { %v1228_v61 = vsel %vm3910_vm7, %v1227_v13, %v1223_v44  ;;  %v1242_v45 = vor.u32 1.1754944e-38, %v1241_v33  ;;  %vm1415_vm4 = vweird.f32 %v3931_v24  ;;  %v1421_v7 = vand.u32 2147483648, %v3931_v24 }
 0x126   : > { %v1555_v19 = vmul.f32 %v1228_v61, %v3746_v63  ;;  %v1399_v51 = vadd.f32 %v2892_v17, %v1398_v1  ;;  %v1232_v18 = vsub.f32 1.0, %v1231_v40  ;;  %2899 = vrcp.f32 %v3950_v2  ;;  %v892_v63 = vpop.f32.mrf.mxu1 }
 0x127   : > { %v2898_v55 = vpop.eup %2897  ;;  %v3971_v28 = vunpack.c.l.b16 %v1598_v37  ;;  %vm1236_vm3 = vweird.f32 %v2896_v49  ;;  %2901 = vpow2.f32 %v2588_v60  ;;  %v1585_v22 = vpack.c.bf16 %v3871_v50, %v3871_v50 }
 0x128   : > { %v1724_v13 = vrot.slane %v1555_v19, 7  ;;  %v1403_v21 = vsel %vm3963_vm2, %v2892_v17, %v1399_v51  ;;  %v1233_v4 = vmul.f32 %v2896_v49, %v1232_v18  ;;  %vm3977_vm5 = vcmp.eq.f32.partialorder %v1419_v39, 8.507059e+37  ;;  %vm1237_vm7 = vmor %vm1235_vm14, %vm1236_vm3 }
 0x129   : > { %v1408_v62 = vsel %vm3940_vm11, %v1407_v16, %v1403_v21  ;;  %v1411_v33 = vmul.f32 %v2898_v55, %v3931_v24  ;;  %v1422_v27 = vor.u32 1.1754944e-38, %v1421_v7  ;;  %v1254_v35 = vand.u32 2147483647, %v3950_v2 }
 0x12a   : > { %v1587_v37 = vpack.c.bf16 %v1555_v19, %v1555_v19  ;;  %v3989_v17 = vsel %vm1730_vm8, %v1723_v0, %v1724_v13  ;;  %v1234_v60 = vadd.f32 %v2896_v49, %v1233_v4  ;;  %vm1250_vm6 = vweird.f32 %v3950_v2  ;;  %v2745_v19 = vld [vmem:[%s3073_s10 + $0x40] sm:$0xff]  }
 0x12b   : > { %v1567_v44 = vmul.f32 %v1408_v62, %v3769_v34  ;;  %v1412_v14 = vsub.f32 1.0, %v1411_v33  ;;  %vm1416_vm9 = vweird.f32 %v2898_v55  ;;  %v1586_v16 = vpack.c.bf16 %v3892_v52, %v3892_v52 }
 0x12c   : > { %v2900_v1 = vpop.eup %2899  ;;  %v1238_v40 = vsel %vm1237_vm7, %v2896_v49, %v1234_v60  ;;  %v1256_v39 = vand.u32 2147483648, %v3950_v2  ;;  %v4000_v0 = vadd.f32 %v3766_v54, %v892_v63  ;;  %v1966_v61 = vpack.c.b16 %v3709_v6, %v3707_v8  ;;  %vm4016_vm11 = vmor %vm1415_vm4, %vm1416_vm9 }
 0x12d   : > { %v2902_v34 = vpop.eup %2901  ;;  %v1243_v36 = vsel %vm3954_vm15, %v1242_v45, %v1238_v40  ;;  %v1413_v10 = vmul.f32 %v2898_v55, %v1412_v14  ;;  %v1246_v7 = vmul.f32 %v2900_v1, %v3950_v2  ;;  %vm4007_vm10 = vcmp.eq.f32.partialorder %v1254_v35, 8.507059e+37 }
 0x12e   : > { %v1861_v52 = vunpack.c.l.b16 %v1587_v37  ;;  %v4012_v49 = vmul.f32 %v1243_v36, %v3781_v31  ;;  %v4020_v8 = vadd.f32 1.0, %v2902_v34  ;;  %v1860_v6 = vunpack.c.l.b16 %v1586_v16  ;;  %1972 = vrot.lane.b32.xlu2 %v1966_v61, %s3003_s16 }
 0x12f   : > { %v1599_v53 = vpack.c.bf16 %v1567_v44, %v1567_v44  ;;  %v1414_v45 = vadd.f32 %v2898_v55, %v1413_v10  ;;  %v1247_v18 = vsub.f32 1.0, %v1246_v7  ;;  %v1859_v21 = vunpack.c.l.b16 %v1585_v22  ;;  %v894_v44 = vpop.f32.mrf.mxu1  ;;  %v2675_v10 = vld [vmem:[%s3073_s10] sm:$0xff]  }
 0x130   : > { %v1588_v31 = vpack.c.bf16 %v4012_v49, %v4012_v49  ;;  %v1725_v4 = vrot.slane %v4012_v49, 7  ;;  %2903 = vrcp.f32 %v4020_v8  ;;  %v2589_v24 = vmul.f32 -1.442695, %v4000_v0  ;;  %v2741_v7 = vld [vmem:[%s3073_s10 + $0x20] sm:$0xff]  }
 0x131   : > { %v1418_v63 = vsel %vm4016_vm11, %v2898_v55, %v1414_v45  ;;  %v1248_v62 = vmul.f32 %v2900_v1, %v1247_v18  ;;  %vm1251_vm12 = vweird.f32 %v2900_v1  ;;  %v1271_v33 = vand.u32 2147483648, %v4020_v8 }
 0x132   : > { %v4033_v35 = vsel %vm1730_vm8, %v1724_v13, %v1725_v4  ;;  %v1862_v22 = vunpack.c.l.b16 %v1588_v31  ;;  %v1423_v37 = vsel %vm3977_vm5, %v1422_v27, %v1418_v63  ;;  %v1867_v60 = vpack.c.b16 %v1860_v6, %v1859_v21  ;;  %vm1252_vm13 = vmor %vm1250_vm6, %vm1251_vm12 }
 0x133   : > { %v1568_v14 = vmul.f32 %v1423_v37, %v3826_v26  ;;  %v1249_v16 = vadd.f32 %v2900_v1, %v1248_v62  ;;  %v1257_v40 = vor.u32 1.1754944e-38, %v1256_v39  ;;  %v1269_v55 = vand.u32 2147483647, %v4020_v8 }
 0x134   : > { %v4039_v61 = vunpack.c.l.b16 %v1599_v53  ;;  %1871 = vrot.lane.b32.xlu1 %v1867_v60, %s3003_s16  ;;  %2905 = vpow2.f32 %v2589_v24  ;;  %v1964_v13 = vpack.c.b16 %v3384_v30, %v3291_v32  ;;  %v4047_v15 = vadd.f32 %v3766_v54, %v894_v44 }
 0x135   : > { %v1253_v26 = vsel %vm1252_vm13, %v2900_v1, %v1249_v16  ;;  %vm1265_vm14 = vweird.f32 %v4020_v8  ;;  %v1272_v27 = vor.u32 1.1754944e-38, %v1271_v33  ;;  %v1965_v2 = vpack.c.b16 %v3570_v9, %v3461_v29  ;;  %v452_v1 = vld [vmem:[%s4534_s1] sm:$0x3] }
 0x136   : > { %v1938_v39 = vpack.c.b16 %v3971_v28, %v3914_v59  ;;  %v2904_v34 = vpop.eup %2903  ;;  %v1600_v36 = vpack.c.bf16 %v1568_v14, %v1568_v14  ;;  %v1258_v32 = vsel %vm4007_vm10, %v1257_v40, %v1253_v26  ;;  %v2590_v30 = vmul.f32 -1.442695, %v4047_v15 }
 0x137   : > { %v1868_v54 = vpack.c.b16 %v1862_v22, %v1861_v52  ;;  %v4063_v49 = vmul.f32 %v1258_v32, %v3863_v43  ;;  %v1261_v51 = vmul.f32 %v2904_v34, %v4020_v8  ;;  %vm4066_vm15 = vcmp.eq.f32.partialorder %v1269_v55, 8.507059e+37  ;;  %v2749_v52 = vld [vmem:[%s3073_s10 + $0x60] sm:$0xff]  }
 0x138   : > { %v1842_v28 = vpack.c.b16 %v3828_v23, %v3732_v11  ;;  %v1612_v6 = vadd.s32 16, %v3155_v58  ;;  %2907 = vpow2.f32 %v2590_v30  ;;  %v472_v53 = vsel %vm470_vm0, %v452_v1, 0 }
 0x139   : > { %1873 = vrot.lane.b32.xlu0 %v1868_v54, %s3003_s16  ;;  %v2676_v43 = vunpack.c.l.bf16 %v2675_v10  ;;  %v2677_v45 = vunpack.c.h.bf16 %v2675_v10  ;;  %v1726_v18 = vrot.slane %v4063_v49, 7  ;;  %v1262_v21 = vsub.f32 1.0, %v1261_v51  ;;  %481 = vmatpush.bf16.msra.mxu0 %v472_v53 }
 0x13a   : > { %vm1266_vm2 = vweird.f32 %v2904_v34  ;;  %v2692_v31 = vunpack.c.l.bf16 %v2741_v7  ;;  %v2906_v24 = vpop.eup %2905  ;;  %v2693_v63 = vunpack.c.h.bf16 %v2741_v7  ;;  %v2708_v62 = vunpack.c.l.bf16 %v2745_v19 }
 0x13b   : > { %v2709_v33 = vunpack.c.h.bf16 %v2745_v19  ;;  %v2724_v22 = vunpack.c.l.bf16 %v2749_v52  ;;  %v1589_v37 = vpack.c.bf16 %v4063_v49, %v4063_v49  ;;  %v4082_v60 = vsel %vm1730_vm8, %v1725_v4, %v1726_v18  ;;  %vm1267_vm0 = vmor %vm1265_vm14, %vm1266_vm2 }
 0x13c   : > { %v1263_v44 = vmul.f32 %v2904_v34, %v1262_v21  ;;  %v4084_v14 = vadd.f32 1.0, %v2906_v24  ;;  %1968 = vrot.lane.b32.xlu1 %v1964_v13, %s3003_s16  ;;  %v2725_v16 = vunpack.c.h.bf16 %v2749_v52  ;;  %v376_v40 = vmax.f32 %v2676_v43, %v2692_v31 }
 0x13d   : > { %v377_v55 = vmax.f32 %v2677_v45, %v2693_v63  ;;  %v408_v26 = vmax.f32 %v2708_v62, %v2724_v22  ;;  %v4087_v32 = vunpack.c.l.b16 %v1600_v36  ;;  %v1967_v54 = vpack.c.b16 %v3868_v3, %v3783_v42  ;;  %v2738_v62 = vld [vmem:[%s3073_s10 + $0x8] sm:$0xff]  }
 0x13e   : > { %v1264_v30 = vadd.f32 %v2904_v34, %v1263_v44  ;;  %2909 = vrcp.f32 %v4084_v14  ;;  %v2908_v1 = vpop.eup %2907  ;;  %v1284_v4 = vand.u32 2147483647, %v4084_v14  ;;  %v1286_v13 = vand.u32 2147483648, %v4084_v14 }
 0x13f   : > { %v409_v10 = vmax.f32 %v2709_v33, %v2725_v16  ;;  %v440_v7 = vmax.f32 %v376_v40, %v408_v26  ;;  %v4097_v49 = vunpack.c.l.b16 %v1589_v37  ;;  %v4099_v51 = vadd.f32 1.0, %v2908_v1  ;;  %v2746_v1 = vld [vmem:[%s3073_s10 + $0x48] sm:$0xff]  }
 0x140   : > { %v1268_v36 = vsel %vm1267_vm0, %v2904_v34, %v1264_v30  ;;  %v1613_v19 = vadd.s32 24, %v3155_v58  ;;  %vm1280_vm4 = vweird.f32 %v4084_v14  ;;  %v1636_v53 = vand.u32 7, %v1612_v6 }
 0x141   : > { %v1273_v52 = vsel %vm4066_vm15, %v1272_v27, %v1268_v36  ;;  %1944 = vrot.lane.b32.xlu0 %v1938_v39, %s3002_s13  ;;  %v441_v8 = vmax.f32 %v377_v55, %v409_v10  ;;  %v1287_v45 = vor.u32 1.1754944e-38, %v1286_v13  ;;  %2911 = vrcp.f32 %v4099_v51 }
 0x142   : > { %v4107_v43 = vmul.f32 %v1273_v52, %v3934_v48  ;;  %v1299_v34 = vand.u32 2147483647, %v4099_v51  ;;  %vm4111_vm3 = vcmp.eq.f32.partialorder %v1284_v4, 8.507059e+37  ;;  %v1301_v27 = vand.u32 2147483648, %v4099_v51  ;;  %v2750_v4 = vld [vmem:[%s3073_s10 + $0x68] sm:$0xff]  }
 0x143   : > { %v448_v59 = vpack.c.bf16 %v441_v8, %v440_v7  ;;  %v1643_v39 = vand.u32 7, %v1613_v19  ;;  %vm4116_vm5 = vcmp.eq.s32.totalorder %v1636_v53, 0  ;;  %vm1295_vm6 = vweird.f32 %v4099_v51 }
 0x144   : > { %v2910_v48 = vpop.eup %2909  ;;  %v1590_v6 = vpack.c.bf16 %v4107_v43, %v4107_v43  ;;  %v1727_v24 = vrot.slane %v4107_v43, 7  ;;  %v1757_v63 = vsel %vm4116_vm5, 0.0, %v3989_v17  ;;  %v4129_v22 = vor.u32 1.1754944e-38, %v1301_v27  ;;  %1970 = vrot.lane.b32.xlu1 %v1965_v2, %s3003_s16  ;;  %v2742_v17 = vld [vmem:[%s3073_s10 + $0x28] sm:$0xff]  }
 0x145   : > { %v1276_v33 = vmul.f32 %v2910_v48, %v4084_v14  ;;  %vm1281_vm7 = vweird.f32 %v2910_v48  ;;  %2483 = vmatmul.msk.bf16.vlgmr.msra.gmra.mxu0 %vm457_vm1, %v448_v59  ;;  %vm4136_vm9 = vcmp.eq.s32.totalorder %v1643_v39, 0  ;;  %v1765_v29 = vpack.c.bf16 %v1757_v63, %v1757_v63 }
 0x146   : > { %v4145_v44 = vsel %vm1730_vm8, %v1726_v18, %v1727_v24  ;;  %v1864_v16 = vunpack.c.l.b16 %v1590_v6  ;;  %v1758_v40 = vsel %vm4136_vm9, 0.0, %v4033_v35  ;;  %vm4150_vm10 = vcmp.eq.f32.partialorder %v1299_v34, 8.507059e+37  ;;  %vm4169_vm12 = vmor %vm1280_vm4, %vm1281_vm7 }
 0x147   : > { %v1277_v9 = vsub.f32 1.0, %v1276_v33  ;;  %v1766_v55 = vpack.c.bf16 %v1758_v40, %v1758_v40  ;;  %v2680_v26 = vunpack.c.l.bf16 %v2738_v62  ;;  %v2681_v30 = vunpack.c.h.bf16 %v2738_v62  ;;  %v2912_v13 = vpop.eup %2911 }
 0x148   : > { %v1869_v18 = vpack.c.b16 %v1864_v16, %v4097_v49  ;;  %v4157_v10 = vunpack.c.l.b16 %v1765_v29  ;;  %v2696_v7 = vunpack.c.l.bf16 %v2742_v17  ;;  %v2697_v36 = vunpack.c.h.bf16 %v2742_v17 }
 0x149   : > { %v1278_v19 = vmul.f32 %v2910_v48, %v1277_v9  ;;  %v1291_v35 = vmul.f32 %v2912_v13, %v4099_v51  ;;  %vm1296_vm11 = vweird.f32 %v2912_v13  ;;  %1849 = vrot.lane.b32.xlu0 %v1842_v28, %s3002_s13  ;;  %v4164_v52 = vunpack.c.l.b16 %v1766_v55 }
 0x14a   : > { %v2712_v8 = vunpack.c.l.bf16 %v2746_v1  ;;  %v2713_v53 = vunpack.c.h.bf16 %v2746_v1  ;;  %v2728_v34 = vunpack.c.l.bf16 %v2750_v4  ;;  %v2729_v27 = vunpack.c.h.bf16 %v2750_v4  ;;  %vm4189_vm13 = vmor %vm1295_vm6, %vm1296_vm11 }
 0x14b   : > { %v1279_v59 = vadd.f32 %v2910_v48, %v1278_v19  ;;  %v1292_v39 = vsub.f32 1.0, %v1291_v35  ;;  %v1820_v6 = vpack.c.b16 %v4164_v52, %v4157_v10  ;;  %v378_v11 = vmax.f32 %v2680_v26, %v2696_v7 }
 0x14c   : > { %v379_v23 = vmax.f32 %v2681_v30, %v2697_v36  ;;  %v410_v28 = vmax.f32 %v2712_v8, %v2728_v34  ;;  %v411_v63 = vmax.f32 %v2713_v53, %v2729_v27  ;;  %v1789_v14 = vsel %vm4116_vm5, 0.0, %v3442_v20  ;;  %1875 = vrot.lane.b32.xlu1 %v1869_v18, %s3003_s16 }
 0x14d   : > { %v1283_v62 = vsel %vm4169_vm12, %v2910_v48, %v1279_v59  ;;  %v1293_v33 = vmul.f32 %v2912_v13, %v1292_v39  ;;  %v1790_v17 = vsel %vm4136_vm9, 0.0, %v3529_v57  ;;  %v1797_v16 = vpack.c.bf16 %v1789_v14, %v1789_v14 }
 0x14e   : > { %v1288_v40 = vsel %vm4111_vm3, %v1287_v45, %v1283_v62  ;;  %v442_v20 = vmax.f32 %v378_v11, %v410_v28  ;;  %v443_v48 = vmax.f32 %v379_v23, %v411_v63  ;;  %v1798_v29 = vpack.c.bf16 %v1790_v17, %v1790_v17  ;;  %v2671_v23 = vld [vmem:[%s4536_s3 + $0x8] sm:$0x30] }
 0x14f   : > { %v1559_v9 = vmul.f32 %v1288_v40, %v4000_v0  ;;  %v1294_v55 = vadd.f32 %v2912_v13, %v1293_v33  ;;  %v4194_v26 = vunpack.c.l.b16 %v1797_v16  ;;  %v1611_v57 = vadd.s32 8, %v3155_v58  ;;  %v2739_v33 = vld [vmem:[%s3073_s10 + $0x10] sm:$0xff]  }
 0x150   : > { %v1939_v45 = vpack.c.b16 %v4087_v32, %v4039_v61  ;;  %v4199_v21 = vunpack.c.l.b16 %v1798_v29  ;;  %v1622_v51 = vand.u32 7, %v3155_v58  ;;  %v1614_v37 = vadd.s32 32, %v3155_v58  ;;  %v2613_v61 = vld [vmem:[%s4536_s3 + $0x10] sm:$0xf]  ;;  %v2672_v32 = vld [vmem:[%s4536_s3 + $0x10] sm:$0x30] }
 0x151   : > { %v1591_v30 = vpack.c.bf16 %v1559_v9, %v1559_v9  ;;  %v1728_v1 = vrot.slane %v1559_v9, 7  ;;  %v1298_v4 = vsel %vm4189_vm13, %v2912_v13, %v1294_v55  ;;  %1974 = vrot.lane.b32.xlu0 %v1967_v54, %s3003_s16  ;;  %v449_v0 = vpack.c.bf16 %v443_v48, %v442_v20  ;;  %v2747_v29 = vld [vmem:[%s3073_s10 + $0x50] sm:$0xff]  }
 0x152   : > { %v1303_v18 = vsel %vm4150_vm10, %v4129_v22, %v1298_v4  ;;  %v1917_v13 = vpack.c.b16 %v4199_v21, %v4194_v26  ;;  %v1629_v7 = vand.u32 7, %v1611_v57  ;;  %vm4220_vm14 = vcmp.eq.s32.totalorder %v1622_v51, 0  ;;  %v2751_v51 = vld [vmem:[%s3073_s10 + $0x70] sm:$0xff]   ;;  %v4374_v26 = vld [vmem:[%s4537_s4] ss:$0 sm:$0xff] }
 0x153   : > { %v4228_v3 = vsel %vm1730_vm8, %v1727_v24, %v1728_v1  ;;  %v1865_v54 = vunpack.c.l.b16 %v1591_v30  ;;  %v1560_v36 = vmul.f32 %v1303_v18, %v4047_v15  ;;  %v1615_v2 = vadd.s32 40, %v3155_v58 }
 0x154   : > { %vm1715_vm15 = vcmp.eq.s32.totalorder %v1629_v7, 0  ;;  %v1650_v22 = vand.u32 7, %v1614_v37  ;;  %v1787_v19 = vsel %vm4220_vm14, 0.0, %v3844_v12  ;;  %v2614_v35 = vor.u32 %v2672_v32, %v2613_v61  ;;  %1946 = vrot.lane.b32.xlu1 %v1939_v45, %s3002_s13  ;;  %v2673_v61 = vld [vmem:[%s4536_s3] sm:$0x30] }
 0x155   : > { %v1592_v49 = vpack.c.bf16 %v1560_v36, %v1560_v36  ;;  %v1729_v8 = vrot.slane %v1560_v36, 7  ;;  %2484 = vmatmul.msk.bf16.gmra.mxu0 %vm457_vm1, %v449_v0  ;;  %v1756_v43 = vsel %vm1715_vm15, 0.0, %v3924_v41  ;;  %v1657_v24 = vand.u32 7, %v1615_v2  ;;  %v2629_v0 = vld [vmem:[%s4536_s3] sm:$0xf] }
 0x156   : > { %v1764_v53 = vpack.c.bf16 %v1756_v43, %v1756_v43  ;;  %vm4238_vm2 = vcmp.eq.s32.totalorder %v1650_v22, 0  ;;  %v1788_v34 = vsel %vm1715_vm15, 0.0, %v3317_v38  ;;  %v1795_v27 = vpack.c.bf16 %v1787_v19, %v1787_v19  ;;  %v2621_v38 = vld [vmem:[%s4536_s3 + $0x8] sm:$0xf]  ;;  %v2744_v43 = vld [vmem:[%s3073_s10 + $0x38] sm:$0xff]  }
 0x157   : > { %v4245_v12 = vsel %vm1730_vm8, %v1728_v1, %v1729_v8  ;;  %v1738_v59 = vsel %vm1730_vm8, %v1729_v8, %v1722_v25  ;;  %v1866_v41 = vunpack.c.l.b16 %v1592_v49  ;;  %vm4251_vm0 = vcmp.eq.s32.totalorder %v1657_v24, 0  ;;  %v2740_v8 = vld [vmem:[%s3073_s10 + $0x18] sm:$0xff]  }
 0x158   : > { %v1755_v11 = vsel %vm4220_vm14, 0.0, %v1738_v59  ;;  %v1759_v50 = vsel %vm4238_vm2, 0.0, %v4082_v60  ;;  %v1760_v25 = vsel %vm4251_vm0, 0.0, %v4145_v44  ;;  %v4269_v14 = vunpack.c.l.b16 %v1764_v53  ;;  %v2743_v60 = vld [vmem:[%s3073_s10 + $0x30] sm:$0xff]  }
 0x159   : > { %v1870_v28 = vpack.c.b16 %v1866_v41, %v1865_v54  ;;  %v1763_v63 = vpack.c.bf16 %v1755_v11, %v1755_v11  ;;  %v1767_v62 = vpack.c.bf16 %v1759_v50, %v1759_v50  ;;  %v1768_v17 = vpack.c.bf16 %v1760_v25, %v1760_v25  ;;  %v2752_v11 = vld [vmem:[%s3073_s10 + $0x78] sm:$0xff]  }
 0x15a   : > { %v1796_v16 = vpack.c.bf16 %v1788_v34, %v1788_v34  ;;  %v4272_v40 = vunpack.c.l.b16 %v1795_v27  ;;  %vm2038_vm8 = vcmask 1045504   ;;  %v2622_v48 = vor.u32 %v2671_v23, %v2621_v38  ;;  %v2748_v27 = vld [vmem:[%s3073_s10 + $0x58] sm:$0xff]  }
 0x15b   : > { %1877 = vrot.lane.b32.xlu2 %v1870_v28, %s3003_s16  ;;  %v4276_v44 = vunpack.c.l.b16 %v1763_v63  ;;  %v4278_v31 = vunpack.c.l.b16 %v1767_v62  ;;  %v2040_v20 = vsel %vm2038_vm8, %v2614_v35, 0  ;;  %v4282_v9 = vunpack.c.l.b16 %v1768_v17 }
 0x15c   : > { %v4284_v55 = vunpack.c.l.b16 %v1796_v16  ;;  %2049 = vmatpush.bf16.msrb.mxu2 %v2040_v20  ;;  %v2684_v57 = vunpack.c.l.bf16 %v2739_v33  ;;  %v2685_v45 = vunpack.c.h.bf16 %v2739_v33  ;;  %v2085_v30 = vsel %vm2038_vm8, %v2622_v48, 0 }
 0x15d   : > { %v1819_v37 = vpack.c.b16 %v4269_v14, %v4276_v44  ;;  %v2700_v1 = vunpack.c.l.bf16 %v2743_v60  ;;  %v2701_v4 = vunpack.c.h.bf16 %v2743_v60  ;;  %v1821_v32 = vpack.c.b16 %v4282_v9, %v4278_v31  ;;  %2094 = vmatpush.bf16.msrb.mxu3 %v2085_v30 }
 0x15e   : > { %v1916_v18 = vpack.c.b16 %v4284_v55, %v4272_v40  ;;  %v2716_v7 = vunpack.c.l.bf16 %v2747_v29  ;;  %v2717_v42 = vunpack.c.h.bf16 %v2747_v29  ;;  %v2732_v54 = vunpack.c.l.bf16 %v2751_v51 }
 0x15f   : > { %v2733_v36 = vunpack.c.h.bf16 %v2751_v51  ;;  %v380_v2 = vmax.f32 %v2684_v57, %v2700_v1  ;;  %v381_v22 = vmax.f32 %v2685_v45, %v2701_v4  ;;  %v2630_v19 = vor.u32 %v2673_v61, %v2629_v0 }
 0x160   : > { %v412_v35 = vmax.f32 %v2716_v7, %v2732_v54  ;;  %v2688_v59 = vunpack.c.l.bf16 %v2740_v8  ;;  %v2689_v41 = vunpack.c.h.bf16 %v2740_v8  ;;  %v2704_v38 = vunpack.c.l.bf16 %v2744_v43 }
 0x161   : > { %v413_v49 = vmax.f32 %v2717_v42, %v2733_v36  ;;  %v2135_v24 = vsel %vm2038_vm8, %v2630_v19, 0  ;;  %v1791_v50 = vsel %vm4238_vm2, 0.0, %v3615_v46  ;;  %v2705_v23 = vunpack.c.h.bf16 %v2744_v43 }
 0x162   : > { %v444_v53 = vmax.f32 %v380_v2, %v412_v35  ;;  %2144 = vmatpush.bf16.msrb.mxu0 %v2135_v24  ;;  %v1792_v28 = vsel %vm4251_vm0, 0.0, %v3687_v5  ;;  %v1799_v63 = vpack.c.bf16 %v1791_v50, %v1791_v50  ;;  %v2720_v62 = vunpack.c.l.bf16 %v2748_v27 }
 0x163   : > { %v445_v34 = vmax.f32 %v381_v22, %v413_v49  ;;  %v1800_v33 = vpack.c.bf16 %v1792_v28, %v1792_v28  ;;  %v1616_v17 = vadd.s32 48, %v3155_v58  ;;  %v1617_v16 = vadd.s32 56, %v3155_v58 }
 0x164   : > { %v2721_v60 = vunpack.c.h.bf16 %v2748_v27  ;;  %v2736_v20 = vunpack.c.l.bf16 %v2752_v11  ;;  %v2737_v48 = vunpack.c.h.bf16 %v2752_v11  ;;  %v4314_v15 = vunpack.c.l.b16 %v1799_v63 }
 0x165   : > { %v450_v25 = vpack.c.bf16 %v445_v34, %v444_v53  ;;  %v1913_v46 = vunpack.c.l.b16 %v1800_v33  ;;  %v1664_v29 = vand.u32 7, %v1616_v17  ;;  %v1671_v57 = vand.u32 7, %v1617_v16  ;;  %v1844_v53 = vpop.permute.xlu0 %1843  ;;  %v1846_v34 = vpop.permute.xlu2 %1845 }
 0x166   : > { %v382_v45 = vmax.f32 %v2688_v59, %v2704_v38  ;;  %v383_v39 = vmax.f32 %v2689_v41, %v2705_v23  ;;  %v414_v58 = vmax.f32 %v2720_v62, %v2736_v20  ;;  %v415_v30 = vmax.f32 %v2721_v60, %v2737_v48 }
 0x167   : > { %2485 = vmatmul.msk.bf16.gmra.mxu0 %vm457_vm1, %v450_v25  ;;  %v1918_v5 = vpack.c.b16 %v1913_v46, %v4314_v15  ;;  %vm1720_vm4 = vcmp.eq.s32.totalorder %v1664_v29, 0  ;;  %vm4317_vm3 = vcmp.eq.s32.totalorder %v1671_v57, 0  ;;  %vm323_vm5 = vcmask 93184  }
 0x168   : > { %v1793_v1 = vsel %vm1720_vm4, 0.0, %v3754_v47  ;;  %v1794_v4 = vsel %vm4317_vm3, 0.0, %v3838_v56  ;;  %v446_v54 = vmax.f32 %v382_v45, %v414_v58  ;;  %v447_v36 = vmax.f32 %v383_v39, %v415_v30 }
 0x169   : > { %v1801_v0 = vpack.c.bf16 %v1793_v1, %v1793_v1  ;;  %v1802_v61 = vpack.c.bf16 %v1794_v4, %v1794_v4  ;;  %v1761_v47 = vsel %vm1720_vm4, 0.0, %v4228_v3  ;;  %v1762_v56 = vsel %vm4317_vm3, 0.0, %v4245_v12 }
 0x16a   : > { %v451_v22 = vpack.c.bf16 %v447_v36, %v446_v54  ;;  %v1769_v19 = vpack.c.bf16 %v1761_v47, %v1761_v47  ;;  %v1770_v35 = vpack.c.bf16 %v1762_v56, %v1762_v56  ;;  %v3004_v24 = vmov 0  }
 0x16b   : > { %v4325_v7 = vunpack.c.l.b16 %v1801_v0  ;;  %v4327_v42 = vunpack.c.l.b16 %v1802_v61  ;;  %324 = vst.msk [vmem:[#allocation2] sm:$0xf] %vm323_vm5, %v3004_v24  ;;  %vm1891_vm6 = vcmask 64512   ;;  %vm2029_vm7 = vcmask 97280  }
 0x16c   : > { %v4336_v49 = vunpack.c.l.b16 %v1769_v19  ;;  %v4338_v8 = vunpack.c.l.b16 %v1770_v35  ;;  %v1881_v12 = vsel %vm457_vm1, %v1819_v37, %v1844_v53  ;;  %vm2001_vm9 = vcmask 1043456  }
 0x16d   : > { %v1919_v2 = vpack.c.b16 %v4327_v42, %v4325_v7  ;;  %v1941_v3 = vpop.permute.xlu0 %1940  ;;  %v1943_v41 = vpop.permute.xlu2 %1942  ;;  %v1884_v37 = vsel %vm457_vm1, %v1820_v6, %v1846_v34  ;;  %vm671_vm15 = vcmask 27648  }
 0x16e   : > { %v1822_v43 = vpack.c.b16 %v4338_v8, %v4336_v49  ;;  %v1978_v11 = vsel %vm457_vm1, %v1916_v18, %v1941_v3  ;;  %v1981_v28 = vsel %vm457_vm1, %v1917_v13, %v1943_v41 }
 0x172   : > { %v1996_v23 = vld [vmem:[#allocation2] sm:$0xf] }
 0x175   : > { %v1848_v40 = vpop.permute.xlu2 %1847 }
 0x176   : > { %v1887_v48 = vsel %vm457_vm1, %v1821_v32, %v1848_v40 }
 0x177   : > { %2486 = vmatmul.msk.bf16.gmra.mxu0 %vm457_vm1, %v451_v22 }
 0x188   : > { %v1973_v52 = vpop.permute.xlu2 %1972 }
 0x1a6   : > { %v1872_v27 = vpop.permute.xlu1 %1871 }
 0x1a7   : > { %v1893_v59 = vsel %vm1891_vm6, %v1881_v12, %v1872_v27 }
 0x1a8   : > { %2623 = vmatmul.msk.bf16.vlgmr.msrb.gmra.mxu3 %vm2029_vm7, %v1893_v59 }
 0x1ab   : > { %v1874_v38 = vpop.permute.xlu0 %1873 }
 0x1ac   : > { %v1895_v55 = vsel %vm1891_vm6, %v1884_v37, %v1874_v38 }
 0x1ae   : > { %v1969_v50 = vpop.permute.xlu1 %1968 }
 0x1af   : > { %v1989_v25 = vsel %vm1891_vm6, %v1978_v11, %v1969_v50 }
 0x1b0   : > { %v2002_v14 = vrot.slane %v1989_v25, 4  ;;  %2615 = vmatmul.msk.bf16.vlgmr.msrb.gmra.mxu2 %vm2029_vm7, %v1989_v25 }
 0x1b2   : > { %v2012_v44 = vsel %vm2001_vm9, %v1996_v23, %v2002_v14 }
 0x1b3   : > { %2631 = vmatmul.msk.bf16.vlgmr.msrb.gmra.mxu0 %vm2029_vm7, %v2012_v44  ;;  %v1945_v18 = vpop.permute.xlu0 %1944 }
 0x1b4   : > { %v1984_v17 = vsel %vm457_vm1, %v1918_v5, %v1945_v18 }
 0x1b5   : > { %v1993_v6 = vsel %vm1891_vm6, %v1984_v17, %v1973_v52  ;;  %v1878_v47 = vpop.permute.xlu2 %1877 }
 0x1b6   : > { %v1971_v63 = vpop.permute.xlu1 %1970  ;;  %v2005_v13 = vrot.slane %v1993_v6, 4 }
 0x1b7   : > { %v1991_v62 = vsel %vm1891_vm6, %v1981_v28, %v1971_v63 }
 0x1b8   : > { %2624 = vmatmul.msk.bf16.gmra.mxu3 %vm2029_vm7, %v1895_v55  ;;  %v2003_v33 = vrot.slane %v1991_v62, 4 }
 0x1ba   : > { %v2004_v10 = vsel %vm2001_vm9, %v2002_v14, %v2003_v33  ;;  %v2006_v46 = vsel %vm2001_vm9, %v2003_v33, %v2005_v13 }
 0x1bb   : > { %v1850_v21 = vpop.permute.xlu0 %1849 }
 0x1bc   : > { %v1890_v42 = vsel %vm457_vm1, %v1822_v43, %v1850_v21 }
 0x1bd   : > { %v1899_v35 = vsel %vm1891_vm6, %v1890_v42, %v1878_v47 }
 0x1be   : > { %v1876_v16 = vpop.permute.xlu1 %1875 }
 0x1bf   : > { %v1897_v29 = vsel %vm1891_vm6, %v1887_v48, %v1876_v16 }
 0x1c0   : > { %2616 = vmatmul.msk.bf16.gmra.mxu2 %vm2029_vm7, %v1991_v62 }
 0x1c2   : > { %v483_v60 = vpop.f32.mrf.mxu0 }
 0x1c3   : > { %v4378_v20 = vadd.f32 %v4374_v26, %v483_v60  ;;  %2632 = vmatmul.msk.bf16.gmra.mxu0 %vm2029_vm7, %v2004_v10  ;;  %v1975_v39 = vpop.permute.xlu0 %1974 }
 0x1c5   : > { %v2487_v15 = vmul.f32 -1.442695, %v4378_v20 }
 0x1c6   : > { %v1947_v57 = vpop.permute.xlu1 %1946 }
 0x1c7   : > { %2913 = vpow2.f32 %v2487_v15  ;;  %v1987_v45 = vsel %vm457_vm1, %v1919_v2, %v1947_v57 }
 0x1c8   : > { %2625 = vmatmul.msk.bf16.gmra.mxu3 %vm2029_vm7, %v1897_v29  ;;  %v1995_v32 = vsel %vm1891_vm6, %v1987_v45, %v1975_v39 }
 0x1c9   : > { %v2013_v30 = vunpack.c.h.b16 %v1995_v32  ;;  %v2007_v1 = vrot.slane %v1995_v32, 4 }
 0x1ca   : > { %v485_v5 = vpop.f32.mrf.mxu0 }
 0x1cb   : > { %v4391_v51 = vadd.f32 %v4374_v26, %v485_v5  ;;  %v2014_v4 = vpack.c.b16 %v2013_v30, %v2013_v30  ;;  %v2008_v36 = vsel %vm2001_vm9, %v2005_v13, %v2007_v1 }
 0x1cd   : > { %v2914_v31 = vpop.eup %2913  ;;  %v2488_v9 = vmul.f32 -1.442695, %v4391_v51  ;;  %2017 = vst.msk [vmem:[#allocation2] sm:$0xf] %vm323_vm5, %v2014_v4 }
 0x1ce   : > { %v527_v58 = vadd.f32 1.0, %v2914_v31 }
 0x1cf   : > { %2915 = vpow2.f32 %v2488_v9 }
 0x1d0   : > { %2917 = vrcp.f32 %v527_v58  ;;  %2617 = vmatmul.msk.bf16.gmra.mxu2 %vm2029_vm7, %v1993_v6  ;;  %v546_v56 = vand.u32 2147483648, %v527_v58  ;;  %vm540_vm10 = vweird.f32 %v527_v58  ;;  %v544_v49 = vand.u32 2147483647, %v527_v58 }
 0x1d2   : > { %v488_v0 = vpop.f32.mrf.mxu0  ;;  %v547_v34 = vor.u32 1.1754944e-38, %v546_v56  ;;  %vm545_vm12 = vcmp.eq.f32.partialorder %v544_v49, 8.507059e+37 }
 0x1d3   : > { %v4398_v61 = vadd.f32 %v4374_v26, %v488_v0  ;;  %2633 = vmatmul.msk.bf16.gmra.mxu0 %vm2029_vm7, %v2006_v46 }
 0x1d5   : > { %v2916_v7 = vpop.eup %2915  ;;  %v2489_v54 = vmul.f32 -1.442695, %v4398_v61 }
 0x1d6   : > { %v2918_v2 = vpop.eup %2917  ;;  %v528_v22 = vadd.f32 1.0, %v2916_v7 }
 0x1d7   : > { %v536_v19 = vmul.f32 %v2918_v2, %v527_v58  ;;  %2919 = vpow2.f32 %v2489_v54  ;;  %vm541_vm11 = vweird.f32 %v2918_v2 }
 0x1d8   : > { %2921 = vrcp.f32 %v528_v22  ;;  %2626 = vmatmul.msk.bf16.gmra.mxu3 %vm2029_vm7, %v1899_v35  ;;  %vm542_vm1 = vmor %vm540_vm10, %vm541_vm11  ;;  %vm555_vm13 = vweird.f32 %v528_v22  ;;  %v561_v25 = vand.u32 2147483648, %v528_v22  ;;  %v559_v44 = vand.u32 2147483647, %v528_v22 }
 0x1d9   : > { %v537_v24 = vsub.f32 1.0, %v536_v19 }
 0x1da   : > { %v490_v8 = vpop.f32.mrf.mxu0  ;;  %v562_v18 = vor.u32 1.1754944e-38, %v561_v25  ;;  %vm560_vm0 = vcmp.eq.f32.partialorder %v559_v44, 8.507059e+37 }
 0x1db   : > { %v538_v43 = vmul.f32 %v2918_v2, %v537_v24  ;;  %v4410_v53 = vadd.f32 %v4374_v26, %v490_v8 }
 0x1dd   : > { %v2920_v3 = vpop.eup %2919  ;;  %v539_v12 = vadd.f32 %v2918_v2, %v538_v43  ;;  %v2490_v27 = vmul.f32 -1.442695, %v4410_v53 }
 0x1de   : > { %v2922_v59 = vpop.eup %2921  ;;  %v529_v41 = vadd.f32 1.0, %v2920_v3 }
 0x1df   : > { %v543_v38 = vsel %vm542_vm1, %v2918_v2, %v539_v12  ;;  %v551_v11 = vmul.f32 %v2922_v59, %v528_v22  ;;  %2923 = vpow2.f32 %v2490_v27  ;;  %vm556_vm14 = vweird.f32 %v2922_v59 }
 0x1e0   : > { %v548_v50 = vsel %vm545_vm12, %v547_v34, %v543_v38  ;;  %2925 = vrcp.f32 %v529_v41  ;;  %2618 = vmatmul.msk.bf16.gmra.mxu2 %vm2029_vm7, %v1995_v32  ;;  %vm4421_vm2 = vmor %vm555_vm13, %vm556_vm14  ;;  %vm570_vm8 = vweird.f32 %v529_v41  ;;  %v574_v13 = vand.u32 2147483647, %v529_v41 }
 0x1e1   : > { %v655_v23 = vmul.f32 %v548_v50, %v4378_v20  ;;  %v552_v14 = vsub.f32 1.0, %v551_v11  ;;  %v576_v60 = vand.u32 2147483648, %v529_v41 }
 0x1e2   : > { %vm575_vm5 = vcmp.eq.f32.partialorder %v574_v13, 8.507059e+37 }
 0x1e3   : > { %v663_v37 = vpack.c.bf16 %v655_v23, %v655_v23  ;;  %v553_v40 = vmul.f32 %v2922_v59, %v552_v14  ;;  %2634 = vmatmul.msk.bf16.gmra.mxu0 %vm2029_vm7, %v2008_v36  ;;  %v577_v29 = vor.u32 1.1754944e-38, %v576_v60 }
 0x1e4   : > { %v493_v28 = vpop.f32.mrf.mxu0 }
 0x1e5   : > { %v2924_v63 = vpop.eup %2923  ;;  %672 = vst.msk [vmem:[%s4419_s17] sm:$0xf] %vm671_vm15, %v663_v37  ;;  %v554_v62 = vadd.f32 %v2922_v59, %v553_v40  ;;  %v4429_v33 = vadd.f32 %v4374_v26, %v493_v28 }
 0x1e6   : > { %v2926_v17 = vpop.eup %2925  ;;  %v530_v10 = vadd.f32 1.0, %v2924_v63 }
 0x1e7   : > { %v558_v52 = vsel %vm4421_vm2, %v2922_v59, %v554_v62  ;;  %v566_v6 = vmul.f32 %v2926_v17, %v529_v41  ;;  %v2491_v16 = vmul.f32 -1.442695, %v4429_v33  ;;  %vm571_vm4 = vweird.f32 %v2926_v17 }
 0x1e8   : > { %v563_v21 = vsel %vm560_vm0, %v562_v18, %v558_v52  ;;  %2927 = vrcp.f32 %v530_v10  ;;  %vm572_vm3 = vmor %vm570_vm8, %vm571_vm4  ;;  %vm585_vm6 = vweird.f32 %v530_v10  ;;  %v589_v30 = vand.u32 2147483647, %v530_v10 }
 0x1e9   : > { %v656_v20 = vmul.f32 %v563_v21, %v4391_v51  ;;  %v567_v48 = vsub.f32 1.0, %v566_v6  ;;  %2929 = vpow2.f32 %v2491_v16  ;;  %v591_v1 = vand.u32 2147483648, %v530_v10 }
 0x1ea   : > { %vm590_vm10 = vcmp.eq.f32.partialorder %v589_v30, 8.507059e+37 }
 0x1eb   : > { %v664_v15 = vpack.c.bf16 %v656_v20, %v656_v20  ;;  %v568_v46 = vmul.f32 %v2926_v17, %v567_v48  ;;  %v592_v36 = vor.u32 1.1754944e-38, %v591_v1 }
 0x1ec   : > { %v495_v57 = vpop.f32.mrf.mxu0 }
 0x1ed   : > { %673 = vst.msk [vmem:[%s4419_s17 + $0x4] sm:$0xf] %vm671_vm15, %v664_v15  ;;  %v569_v45 = vadd.f32 %v2926_v17, %v568_v46  ;;  %v4438_v39 = vadd.f32 %v4374_v26, %v495_v57 }
 0x1ee   : > { %v2928_v5 = vpop.eup %2927 }
 0x1ef   : > { %v2930_v31 = vpop.eup %2929  ;;  %v573_v9 = vsel %vm572_vm3, %v2926_v17, %v569_v45  ;;  %v581_v32 = vmul.f32 %v2928_v5, %v530_v10  ;;  %v2492_v51 = vmul.f32 -1.442695, %v4438_v39  ;;  %vm586_vm7 = vweird.f32 %v2928_v5 }
 0x1f0   : > { %v578_v58 = vsel %vm575_vm5, %v577_v29, %v573_v9  ;;  %v531_v4 = vadd.f32 1.0, %v2930_v31  ;;  %vm587_vm9 = vmor %vm585_vm6, %vm586_vm7 }
 0x1f1   : > { %v657_v0 = vmul.f32 %v578_v58, %v4398_v61  ;;  %v582_v7 = vsub.f32 1.0, %v581_v32  ;;  %2931 = vpow2.f32 %v2492_v51 }
 0x1f2   : > { %2933 = vrcp.f32 %v531_v4  ;;  %vm600_vm11 = vweird.f32 %v531_v4  ;;  %v606_v34 = vand.u32 2147483648, %v531_v4  ;;  %v604_v27 = vand.u32 2147483647, %v531_v4 }
 0x1f3   : > { %v665_v42 = vpack.c.bf16 %v657_v0, %v657_v0  ;;  %v583_v54 = vmul.f32 %v2928_v5, %v582_v7 }
 0x1f4   : > { %v498_v2 = vpop.f32.mrf.mxu0  ;;  %v607_v11 = vor.u32 1.1754944e-38, %v606_v34  ;;  %vm605_vm13 = vcmp.eq.f32.partialorder %v604_v27, 8.507059e+37 }
 0x1f5   : > { %674 = vst.msk [vmem:[%s4419_s17 + $0x8] sm:$0xf] %vm671_vm15, %v665_v42  ;;  %v584_v22 = vadd.f32 %v2928_v5, %v583_v54  ;;  %v4445_v47 = vadd.f32 %v4374_v26, %v498_v2 }
 0x1f7   : > { %v2932_v19 = vpop.eup %2931  ;;  %v588_v56 = vsel %vm587_vm9, %v2928_v5, %v584_v22  ;;  %v2493_v61 = vmul.f32 -1.442695, %v4445_v47 }
 0x1f8   : > { %v2934_v35 = vpop.eup %2933  ;;  %v593_v24 = vsel %vm590_vm10, %v592_v36, %v588_v56  ;;  %v532_v49 = vadd.f32 1.0, %v2932_v19 }
 0x1f9   : > { %v658_v8 = vmul.f32 %v593_v24, %v4410_v53  ;;  %v596_v43 = vmul.f32 %v2934_v35, %v531_v4  ;;  %2935 = vpow2.f32 %v2493_v61  ;;  %vm601_vm1 = vweird.f32 %v2934_v35  ;;  %v4470_v61 = vld [vmem:[%s4539_s6] ss:$0 sm:$0xff] }
 0x1fa   : > { %2937 = vrcp.f32 %v532_v49  ;;  %vm602_vm12 = vmor %vm600_vm11, %vm601_vm1  ;;  %vm615_vm14 = vweird.f32 %v532_v49  ;;  %v621_v55 = vand.u32 2147483648, %v532_v49  ;;  %v619_v28 = vand.u32 2147483647, %v532_v49 }
 0x1fb   : > { %v666_v3 = vpack.c.bf16 %v658_v8, %v658_v8  ;;  %v597_v12 = vsub.f32 1.0, %v596_v43 }
 0x1fc   : > { %v500_v59 = vpop.f32.mrf.mxu0  ;;  %v622_v17 = vor.u32 1.1754944e-38, %v621_v55  ;;  %vm620_vm8 = vcmp.eq.f32.partialorder %v619_v28, 8.507059e+37 }
 0x1fd   : > { %675 = vst.msk [vmem:[%s4419_s17 + $0xc] sm:$0xf] %vm671_vm15, %v666_v3  ;;  %v598_v41 = vmul.f32 %v2934_v35, %v597_v12  ;;  %v4452_v38 = vadd.f32 %v4374_v26, %v500_v59 }
 0x1ff   : > { %v2936_v50 = vpop.eup %2935  ;;  %v599_v53 = vadd.f32 %v2934_v35, %v598_v41  ;;  %v2494_v25 = vmul.f32 -1.442695, %v4452_v38 }
 0x200   : > { %v2938_v23 = vpop.eup %2937  ;;  %v533_v14 = vadd.f32 1.0, %v2936_v50 }
 0x201   : > { %v603_v44 = vsel %vm602_vm12, %v2934_v35, %v599_v53  ;;  %v611_v37 = vmul.f32 %v2938_v23, %v532_v49  ;;  %2939 = vpow2.f32 %v2494_v25  ;;  %vm616_vm2 = vweird.f32 %v2938_v23 }
 0x202   : > { %v608_v40 = vsel %vm605_vm13, %v607_v11, %v603_v44  ;;  %2941 = vrcp.f32 %v533_v14  ;;  %vm617_vm0 = vmor %vm615_vm14, %vm616_vm2  ;;  %vm630_vm4 = vweird.f32 %v533_v14  ;;  %v634_v15 = vand.u32 2147483647, %v533_v14 }
 0x203   : > { %v659_v26 = vmul.f32 %v608_v40, %v4429_v33  ;;  %v612_v18 = vsub.f32 1.0, %v611_v37  ;;  %v636_v33 = vand.u32 2147483648, %v533_v14 }
 0x204   : > { %vm635_vm6 = vcmp.eq.f32.partialorder %v634_v15, 8.507059e+37 }
 0x205   : > { %v667_v63 = vpack.c.bf16 %v659_v26, %v659_v26  ;;  %v613_v62 = vmul.f32 %v2938_v23, %v612_v18  ;;  %v637_v57 = vor.u32 1.1754944e-38, %v636_v33 }
 0x207   : > { %v2940_v10 = vpop.eup %2939  ;;  %676 = vst.msk [vmem:[%s4419_s17 + $0x10] sm:$0xf] %vm671_vm15, %v667_v63  ;;  %v614_v52 = vadd.f32 %v2938_v23, %v613_v62 }
 0x208   : > { %v2942_v6 = vpop.eup %2941  ;;  %v534_v16 = vadd.f32 1.0, %v2940_v10 }
 0x209   : > { %v618_v21 = vsel %vm617_vm0, %v2938_v23, %v614_v52  ;;  %v626_v13 = vmul.f32 %v2942_v6, %v533_v14  ;;  %vm631_vm3 = vweird.f32 %v2942_v6 }
 0x20a   : > { %v623_v60 = vsel %vm620_vm8, %v622_v17, %v618_v21  ;;  %2943 = vrcp.f32 %v534_v16  ;;  %vm632_vm5 = vmor %vm630_vm4, %vm631_vm3  ;;  %vm645_vm7 = vweird.f32 %v534_v16  ;;  %v651_v51 = vand.u32 2147483648, %v534_v16 }
 0x20b   : > { %v660_v20 = vmul.f32 %v623_v60, %v4438_v39  ;;  %v627_v48 = vsub.f32 1.0, %v626_v13  ;;  %v649_v30 = vand.u32 2147483647, %v534_v16 }
 0x20c   : > { %v652_v0 = vor.u32 1.1754944e-38, %v651_v51 }
 0x20d   : > { %v668_v46 = vpack.c.bf16 %v660_v20, %v660_v20  ;;  %v628_v29 = vmul.f32 %v2942_v6, %v627_v48  ;;  %vm650_vm11 = vcmp.eq.f32.partialorder %v649_v30, 8.507059e+37 }
 0x20f   : > { %677 = vst.msk [vmem:[%s4419_s17 + $0x14] sm:$0xf] %vm671_vm15, %v668_v46  ;;  %v629_v45 = vadd.f32 %v2942_v6, %v628_v29 }
 0x210   : > { %v2944_v5 = vpop.eup %2943 }
 0x211   : > { %v633_v31 = vsel %vm632_vm5, %v2942_v6, %v629_v45  ;;  %v641_v9 = vmul.f32 %v2944_v5, %v534_v16  ;;  %vm646_vm9 = vweird.f32 %v2944_v5 }
 0x212   : > { %v638_v32 = vsel %vm635_vm6, %v637_v57, %v633_v31  ;;  %vm647_vm10 = vmor %vm645_vm7, %vm646_vm9 }
 0x213   : > { %v661_v39 = vmul.f32 %v638_v32, %v4445_v47  ;;  %v642_v58 = vsub.f32 1.0, %v641_v9 }
 0x215   : > { %v669_v1 = vpack.c.bf16 %v661_v39, %v661_v39  ;;  %v643_v4 = vmul.f32 %v2944_v5, %v642_v58 }
 0x217   : > { %678 = vst.msk [vmem:[%s4419_s17 + $0x18] sm:$0xf] %vm671_vm15, %v669_v1  ;;  %v644_v7 = vadd.f32 %v2944_v5, %v643_v4 }
 0x219   : > { %v648_v42 = vsel %vm647_vm10, %v2944_v5, %v644_v7 }
 0x21a   : > { %v653_v54 = vsel %vm650_vm11, %v652_v0, %v648_v42 }
 0x21b   : > { %v662_v36 = vmul.f32 %v653_v54, %v4452_v38 }
 0x21d   : > { %v670_v2 = vpack.c.bf16 %v662_v36, %v662_v36 }
 0x21f   : > { %679 = vst.msk [vmem:[%s4419_s17 + $0x1c] sm:$0xf] %vm671_vm15, %v670_v2 }
 0x22b   : > { %v2096_v22 = vpop.f32.mrf.mxu3 }
 0x230   : > { %v2146_v47 = vpop.f32.mrf.mxu0 }
 0x233   : > { %v2051_v19 = vpop.f32.mrf.mxu2  ;;  %v2098_v8 = vpop.f32.mrf.mxu3 }
 0x234   : > { %v2097_v56 = vadd.f32 %v2096_v22, %v2051_v19 }
 0x236   : > { %v2166_v35 = vadd.f32 %v2146_v47, %v2097_v56 }
 0x238   : > { %v2178_v24 = vadd.f32 %v4470_v61, %v2166_v35  ;;  %v2148_v43 = vpop.f32.mrf.mxu0 }
 0x23a   : > { %v2635_v49 = vmul.f32 -1.442695, %v2178_v24 }
 0x23b   : > { %v2053_v34 = vpop.f32.mrf.mxu2  ;;  %v2101_v38 = vpop.f32.mrf.mxu3 }
 0x23c   : > { %2945 = vpow2.f32 %v2635_v49  ;;  %v2099_v3 = vadd.f32 %v2098_v8, %v2053_v34 }
 0x23e   : > { %v2167_v12 = vadd.f32 %v2148_v43, %v2099_v3 }
 0x240   : > { %v4474_v27 = vadd.f32 %v4470_v61, %v2167_v12  ;;  %v2151_v11 = vpop.f32.mrf.mxu0 }
 0x242   : > { %v2946_v59 = vpop.eup %2945  ;;  %v2636_v41 = vmul.f32 -1.442695, %v4474_v27 }
 0x243   : > { %v2210_v50 = vadd.f32 1.0, %v2946_v59  ;;  %v2056_v53 = vpop.f32.mrf.mxu2  ;;  %v2103_v40 = vpop.f32.mrf.mxu3 }
 0x244   : > { %2947 = vpow2.f32 %v2636_v41  ;;  %v2102_v25 = vadd.f32 %v2101_v38, %v2056_v53 }
 0x245   : > { %2949 = vrcp.f32 %v2210_v50  ;;  %v2229_v52 = vand.u32 2147483648, %v2210_v50  ;;  %v2227_v16 = vand.u32 2147483647, %v2210_v50  ;;  %vm2223_vm12 = vweird.f32 %v2210_v50 }
 0x246   : > { %v2168_v23 = vadd.f32 %v2151_v11, %v2102_v25 }
 0x247   : > { %v2230_v15 = vor.u32 1.1754944e-38, %v2229_v52  ;;  %vm2228_vm14 = vcmp.eq.f32.partialorder %v2227_v16, 8.507059e+37 }
 0x248   : > { %v4478_v14 = vadd.f32 %v4470_v61, %v2168_v23  ;;  %v2153_v55 = vpop.f32.mrf.mxu0 }
 0x24a   : > { %v2948_v44 = vpop.eup %2947  ;;  %v2637_v37 = vmul.f32 -1.442695, %v4478_v14 }
 0x24b   : > { %v2950_v26 = vpop.eup %2949  ;;  %v2211_v18 = vadd.f32 1.0, %v2948_v44  ;;  %v2058_v28 = vpop.f32.mrf.mxu2 }
 0x24c   : > { %v2219_v63 = vmul.f32 %v2950_v26, %v2210_v50  ;;  %2951 = vpow2.f32 %v2637_v37  ;;  %v2104_v62 = vadd.f32 %v2103_v40, %v2058_v28  ;;  %vm2224_vm1 = vweird.f32 %v2950_v26  ;;  %v2106_v20 = vpop.f32.mrf.mxu3 }
 0x24d   : > { %2953 = vrcp.f32 %v2211_v18  ;;  %vm2225_vm13 = vmor %vm2223_vm12, %vm2224_vm1  ;;  %v2242_v39 = vand.u32 2147483647, %v2211_v18  ;;  %v2244_v58 = vand.u32 2147483648, %v2211_v18  ;;  %vm2238_vm0 = vweird.f32 %v2211_v18 }
 0x24e   : > { %v2220_v17 = vsub.f32 1.0, %v2219_v63  ;;  %v2169_v10 = vadd.f32 %v2153_v55, %v2104_v62 }
 0x24f   : > { %v2245_v36 = vor.u32 1.1754944e-38, %v2244_v58  ;;  %vm2243_vm4 = vcmp.eq.f32.partialorder %v2242_v39, 8.507059e+37 }
 0x250   : > { %v2221_v6 = vmul.f32 %v2950_v26, %v2220_v17  ;;  %v4482_v21 = vadd.f32 %v4470_v61, %v2169_v10  ;;  %v2156_v29 = vpop.f32.mrf.mxu0 }
 0x252   : > { %v2952_v13 = vpop.eup %2951  ;;  %v2222_v60 = vadd.f32 %v2950_v26, %v2221_v6  ;;  %v2638_v33 = vmul.f32 -1.442695, %v4482_v21 }
 0x253   : > { %v2954_v48 = vpop.eup %2953  ;;  %v2212_v46 = vadd.f32 1.0, %v2952_v13  ;;  %v2061_v57 = vpop.f32.mrf.mxu2 }
 0x254   : > { %v2226_v45 = vsel %vm2225_vm13, %v2950_v26, %v2222_v60  ;;  %v2234_v5 = vmul.f32 %v2954_v48, %v2211_v18  ;;  %2955 = vpow2.f32 %v2638_v33  ;;  %v2107_v51 = vadd.f32 %v2106_v20, %v2061_v57  ;;  %v2108_v56 = vpop.f32.mrf.mxu3 }
 0x255   : > { %v2231_v31 = vsel %vm2228_vm14, %v2230_v15, %v2226_v45  ;;  %2957 = vrcp.f32 %v2212_v46  ;;  %vm2239_vm2 = vweird.f32 %v2954_v48  ;;  %v2259_v34 = vand.u32 2147483648, %v2212_v46 }
 0x256   : > { %v2338_v9 = vmul.f32 %v2231_v31, %v2178_v24  ;;  %v2235_v32 = vsub.f32 1.0, %v2234_v5  ;;  %v2170_v4 = vadd.f32 %v2156_v29, %v2107_v51  ;;  %vm2240_vm8 = vmor %vm2238_vm0, %vm2239_vm2  ;;  %v2257_v41 = vand.u32 2147483647, %v2212_v46 }
 0x257   : > { %vm2253_vm5 = vweird.f32 %v2212_v46  ;;  %v2260_v53 = vor.u32 1.1754944e-38, %v2259_v34 }
 0x258   : > { %v2346_v30 = vpack.c.bf16 %v2338_v9, %v2338_v9  ;;  %v2236_v1 = vmul.f32 %v2954_v48, %v2235_v32  ;;  %v4488_v42 = vadd.f32 %v4470_v61, %v2170_v4  ;;  %v2158_v24 = vpop.f32.mrf.mxu0  ;;  %vm2258_vm7 = vcmp.eq.f32.partialorder %v2257_v41, 8.507059e+37 }
 0x25a   : > { %v2956_v0 = vpop.eup %2955  ;;  %2643 = vst.msk [vmem:[%s4419_s17 + $0x20] sm:$0xf] %vm671_vm15, %v2346_v30  ;;  %v2237_v7 = vadd.f32 %v2954_v48, %v2236_v1  ;;  %v2639_v19 = vmul.f32 -1.442695, %v4488_v42 }
 0x25b   : > { %v2958_v54 = vpop.eup %2957  ;;  %v2213_v2 = vadd.f32 1.0, %v2956_v0  ;;  %v2063_v49 = vpop.f32.mrf.mxu2 }
 0x25c   : > { %v2241_v22 = vsel %vm2240_vm8, %v2954_v48, %v2237_v7  ;;  %v2249_v47 = vmul.f32 %v2958_v54, %v2212_v46  ;;  %v2109_v3 = vadd.f32 %v2108_v56, %v2063_v49  ;;  %vm2254_vm3 = vweird.f32 %v2958_v54  ;;  %v2111_v28 = vpop.f32.mrf.mxu3 }
 0x25d   : > { %v2246_v35 = vsel %vm2243_vm4, %v2245_v36, %v2241_v22  ;;  %2959 = vrcp.f32 %v2213_v2  ;;  %vm2255_vm6 = vmor %vm2253_vm5, %vm2254_vm3  ;;  %v2272_v63 = vand.u32 2147483647, %v2213_v2  ;;  %v2274_v62 = vand.u32 2147483648, %v2213_v2 }
 0x25e   : > { %v2339_v8 = vmul.f32 %v2246_v35, %v4474_v27  ;;  %v2250_v43 = vsub.f32 1.0, %v2249_v47  ;;  %2961 = vpow2.f32 %v2639_v19  ;;  %v2171_v38 = vadd.f32 %v2158_v24, %v2109_v3 }
 0x25f   : > { %vm2268_vm10 = vweird.f32 %v2213_v2  ;;  %v2275_v33 = vor.u32 1.1754944e-38, %v2274_v62  ;;  %vm2273_vm1 = vcmp.eq.f32.partialorder %v2272_v63, 8.507059e+37 }
 0x260   : > { %v2347_v12 = vpack.c.bf16 %v2339_v8, %v2339_v8  ;;  %v2251_v59 = vmul.f32 %v2958_v54, %v2250_v43  ;;  %v4495_v25 = vadd.f32 %v4470_v61, %v2171_v38  ;;  %v2161_v17 = vpop.f32.mrf.mxu0 }
 0x262   : > { %2644 = vst.msk [vmem:[%s4419_s17 + $0x24] sm:$0xf] %vm671_vm15, %v2347_v12  ;;  %v2252_v11 = vadd.f32 %v2958_v54, %v2251_v59  ;;  %v2640_v55 = vmul.f32 -1.442695, %v4495_v25 }
 0x263   : > { %v2960_v50 = vpop.eup %2959  ;;  %v2066_v10 = vpop.f32.mrf.mxu2 }
 0x264   : > { %v2962_v27 = vpop.eup %2961  ;;  %v2256_v23 = vsel %vm2255_vm6, %v2958_v54, %v2252_v11  ;;  %v2264_v44 = vmul.f32 %v2960_v50, %v2213_v2  ;;  %vm2269_vm9 = vweird.f32 %v2960_v50  ;;  %v2112_v16 = vadd.f32 %v2111_v28, %v2066_v10  ;;  %v2113_v31 = vpop.f32.mrf.mxu3 }
 0x265   : > { %v2261_v37 = vsel %vm2258_vm7, %v2260_v53, %v2256_v23  ;;  %v2214_v40 = vadd.f32 1.0, %v2962_v27  ;;  %vm2270_vm11 = vmor %vm2268_vm10, %vm2269_vm9 }
 0x266   : > { %v2340_v26 = vmul.f32 %v2261_v37, %v4478_v14  ;;  %v2265_v18 = vsub.f32 1.0, %v2264_v44  ;;  %v2172_v60 = vadd.f32 %v2161_v17, %v2112_v16 }
 0x267   : > { %2963 = vrcp.f32 %v2214_v40  ;;  %v2289_v58 = vand.u32 2147483648, %v2214_v40  ;;  %v2287_v4 = vand.u32 2147483647, %v2214_v40  ;;  %vm2283_vm13 = vweird.f32 %v2214_v40 }
 0x268   : > { %v2348_v52 = vpack.c.bf16 %v2340_v26, %v2340_v26  ;;  %v2266_v6 = vmul.f32 %v2960_v50, %v2265_v18  ;;  %2965 = vpow2.f32 %v2640_v55  ;;  %v4502_v20 = vadd.f32 %v4470_v61, %v2172_v60  ;;  %v2163_v30 = vpop.f32.mrf.mxu0 }
 0x269   : > { %v2290_v54 = vor.u32 1.1754944e-38, %v2289_v58  ;;  %vm2288_vm2 = vcmp.eq.f32.partialorder %v2287_v4, 8.507059e+37 }
 0x26a   : > { %2645 = vst.msk [vmem:[%s4419_s17 + $0x28] sm:$0xf] %vm671_vm15, %v2348_v52  ;;  %v2267_v13 = vadd.f32 %v2960_v50, %v2266_v6  ;;  %v2641_v45 = vmul.f32 -1.442695, %v4502_v20 }
 0x26b   : > { %v2068_v9 = vpop.f32.mrf.mxu2 }
 0x26c   : > { %v2271_v14 = vsel %vm2270_vm11, %v2960_v50, %v2267_v13  ;;  %2967 = vpow2.f32 %v2641_v45  ;;  %v2114_v39 = vadd.f32 %v2113_v31, %v2068_v9 }
 0x26d   : > { %v2964_v48 = vpop.eup %2963  ;;  %v2276_v15 = vsel %vm2273_vm1, %v2275_v33, %v2271_v14 }
 0x26e   : > { %v2966_v46 = vpop.eup %2965  ;;  %v2341_v29 = vmul.f32 %v2276_v15, %v4482_v21  ;;  %v2279_v57 = vmul.f32 %v2964_v48, %v2214_v40  ;;  %vm2284_vm12 = vweird.f32 %v2964_v48  ;;  %v2173_v0 = vadd.f32 %v2163_v30, %v2114_v39 }
 0x26f   : > { %v2215_v5 = vadd.f32 1.0, %v2966_v46  ;;  %vm2285_vm14 = vmor %vm2283_vm13, %vm2284_vm12 }
 0x270   : > { %v2349_v32 = vpack.c.bf16 %v2341_v29, %v2341_v29  ;;  %v2280_v51 = vsub.f32 1.0, %v2279_v57  ;;  %v4509_v7 = vadd.f32 %v4470_v61, %v2173_v0 }
 0x271   : > { %2969 = vrcp.f32 %v2215_v5  ;;  %v2304_v61 = vand.u32 2147483648, %v2215_v5  ;;  %v2302_v34 = vand.u32 2147483647, %v2215_v5  ;;  %vm2298_vm8 = vweird.f32 %v2215_v5 }
 0x272   : > { %2646 = vst.msk [vmem:[%s4419_s17 + $0x2c] sm:$0xf] %vm671_vm15, %v2349_v32  ;;  %v2281_v1 = vmul.f32 %v2964_v48, %v2280_v51  ;;  %v2968_v36 = vpop.eup %2967  ;;  %v2642_v22 = vmul.f32 -1.442695, %v4509_v7 }
 0x273   : > { %v2216_v56 = vadd.f32 1.0, %v2968_v36  ;;  %v2305_v41 = vor.u32 1.1754944e-38, %v2304_v61  ;;  %vm2303_vm3 = vcmp.eq.f32.partialorder %v2302_v34, 8.507059e+37 }
 0x274   : > { %v2282_v21 = vadd.f32 %v2964_v48, %v2281_v1  ;;  %2971 = vpow2.f32 %v2642_v22 }
 0x275   : > { %2973 = vrcp.f32 %v2216_v56  ;;  %v2319_v23 = vand.u32 2147483648, %v2216_v56  ;;  %v2317_v40 = vand.u32 2147483647, %v2216_v56  ;;  %vm2313_vm6 = vweird.f32 %v2216_v56 }
 0x276   : > { %v2286_v2 = vsel %vm2285_vm14, %v2964_v48, %v2282_v21 }
 0x277   : > { %v2970_v47 = vpop.eup %2969  ;;  %v2291_v19 = vsel %vm2288_vm2, %v2290_v54, %v2286_v2  ;;  %v2320_v18 = vor.u32 1.1754944e-38, %v2319_v23  ;;  %vm2318_vm9 = vcmp.eq.f32.partialorder %v2317_v40, 8.507059e+37 }
 0x278   : > { %v2342_v35 = vmul.f32 %v2291_v19, %v4488_v42  ;;  %v2294_v24 = vmul.f32 %v2970_v47, %v2215_v5  ;;  %vm2299_vm0 = vweird.f32 %v2970_v47 }
 0x279   : > { %vm2300_vm4 = vmor %vm2298_vm8, %vm2299_vm0 }
 0x27a   : > { %v2350_v49 = vpack.c.bf16 %v2342_v35, %v2342_v35  ;;  %v2295_v8 = vsub.f32 1.0, %v2294_v24  ;;  %v2972_v3 = vpop.eup %2971 }
 0x27b   : > { %v2974_v59 = vpop.eup %2973  ;;  %v2217_v38 = vadd.f32 1.0, %v2972_v3 }
 0x27c   : > { %2647 = vst.msk [vmem:[%s4419_s17 + $0x30] sm:$0xf] %vm671_vm15, %v2350_v49  ;;  %v2296_v43 = vmul.f32 %v2970_v47, %v2295_v8  ;;  %v2309_v11 = vmul.f32 %v2974_v59, %v2216_v56  ;;  %vm2314_vm5 = vweird.f32 %v2974_v59 }
 0x27d   : > { %2975 = vrcp.f32 %v2217_v38  ;;  %vm2315_vm7 = vmor %vm2313_vm6, %vm2314_vm5  ;;  %v2334_v10 = vand.u32 2147483648, %v2217_v38  ;;  %v2332_v16 = vand.u32 2147483647, %v2217_v38  ;;  %vm2328_vm11 = vweird.f32 %v2217_v38 }
 0x27e   : > { %v2297_v12 = vadd.f32 %v2970_v47, %v2296_v43  ;;  %v2310_v27 = vsub.f32 1.0, %v2309_v11 }
 0x27f   : > { %v2335_v60 = vor.u32 1.1754944e-38, %v2334_v10  ;;  %vm2333_vm12 = vcmp.eq.f32.partialorder %v2332_v16, 8.507059e+37 }
 0x280   : > { %v2301_v42 = vsel %vm2300_vm4, %v2970_v47, %v2297_v12  ;;  %v2311_v37 = vmul.f32 %v2974_v59, %v2310_v27 }
 0x281   : > { %v2306_v50 = vsel %vm2303_vm3, %v2305_v41, %v2301_v42 }
 0x282   : > { %v2343_v53 = vmul.f32 %v2306_v50, %v4495_v25  ;;  %v2312_v55 = vadd.f32 %v2974_v59, %v2311_v37 }
 0x283   : > { %v2976_v26 = vpop.eup %2975 }
 0x284   : > { %v2351_v44 = vpack.c.bf16 %v2343_v53, %v2343_v53  ;;  %v2316_v28 = vsel %vm2315_vm7, %v2974_v59, %v2312_v55  ;;  %v2324_v63 = vmul.f32 %v2976_v26, %v2217_v38  ;;  %vm2329_vm10 = vweird.f32 %v2976_v26 }
 0x285   : > { %v2321_v62 = vsel %vm2318_vm9, %v2320_v18, %v2316_v28  ;;  %vm2330_vm1 = vmor %vm2328_vm11, %vm2329_vm10 }
 0x286   : > { %2648 = vst.msk [vmem:[%s4419_s17 + $0x34] sm:$0xf] %vm671_vm15, %v2351_v44  ;;  %v2344_v25 = vmul.f32 %v2321_v62, %v4502_v20  ;;  %v2325_v17 = vsub.f32 1.0, %v2324_v63 }
 0x288   : > { %v2352_v52 = vpack.c.bf16 %v2344_v25, %v2344_v25  ;;  %v2326_v6 = vmul.f32 %v2976_v26, %v2325_v17 }
 0x28a   : > { %2649 = vst.msk [vmem:[%s4419_s17 + $0x38] sm:$0xf] %vm671_vm15, %v2352_v52  ;;  %v2327_v13 = vadd.f32 %v2976_v26, %v2326_v6 }
 0x28c   : > { %v2331_v33 = vsel %vm2330_vm1, %v2976_v26, %v2327_v13 }
 0x28d   : > { %v2336_v14 = vsel %vm2333_vm12, %v2335_v60, %v2331_v33 }
 0x28e   : > { %v2345_v48 = vmul.f32 %v2336_v14, %v4509_v7 }
 0x290   : > { %v2353_v15 = vpack.c.bf16 %v2345_v48, %v2345_v48 }
 0x292   : > { %2650 = vst.msk [vmem:[%s4419_s17 + $0x3c] sm:$0xf] %vm671_vm15, %v2353_v15 }
 0x293 PF: > { %s17_s26 = sadd.s32 1, %s3000_s26   ;;  %s4661_s24 = smov %s2996_s25 }
 0x294   : > { %p14_p5 = scmp.ge.s32.totalorder %s17_s26, 4   ;;  %s4662_s25 = smov %s4664_s27 }
 0x296   :  { %16 = sbr.rel (!%p14_p5) target bundleno = 2 (0x2), region = 88 }

</bundles_post_ra>
